<compile_context>
chip_gen: v7x
topology: tpu7x:2x2x1
jax: 0.10.0
libtpu: 0.0.40
codegen_flags: <defaults>
</compile_context>

<pallas_src>
import functools

import jax
import jax.numpy as jnp
from jax.experimental import pallas as pl
from jax.experimental.pallas import tpu as pltpu


_VMEM = pl.BlockSpec(memory_space=pltpu.MemorySpace.VMEM)


def _round_up(x, m):
    return (x + m - 1) // m * m


# ----------------------------------------------------------------------------
# LSTM gate nonlinearity (PyTorch gate order: i, f, g, o).
# `gates` = x @ W_ih^T + h @ W_hh^T + (b_ih + b_hh), shape (B, 4H).
# ----------------------------------------------------------------------------
def _apply_gates(gates, c, H):
    i = jax.nn.sigmoid(gates[:, 0 * H:1 * H])
    f = jax.nn.sigmoid(gates[:, 1 * H:2 * H])
    g = jnp.tanh(gates[:, 2 * H:3 * H])
    o = jax.nn.sigmoid(gates[:, 3 * H:4 * H])
    c_new = f * c + i * g
    h_new = o * jnp.tanh(c_new)
    return h_new, c_new


# ----------------------------------------------------------------------------
# ONE fused kernel: BiLSTM encoder + shift-reduce loop + output linear.
#   x_ref     : (T*B, E)        time-major embeddings, flattened
#   wih_ref   : (E, 8*H2)       [W_ih_fwd^T | W_ih_bwd^T]
#   whh_ref   : (2*H2, 8*H2)    block-diag [W_hh_fwd^T ; W_hh_bwd^T]
#   b_ref     : (1, 8*H2)       [b_fwd | b_bwd]  (b_ih + b_hh fused)
#   wih_c_ref : (H, 4H)         LSTMCell W_ih^T
#   whh_c_ref : (H, 4H)         LSTMCell W_hh^T
#   bc_ref    : (1, 4H)         LSTMCell bias (b_ih + b_hh)
#   wmod_ref  : (M, H, H)       module-network Linear weights^T (stacked)
#   bmod_ref  : (M, 1, H)       module-network Linear biases (stacked)
#   wout_ref  : (H, O_pad)      output Linear weight^T, zero-padded to 128 lanes
#   bout_ref  : (1, O_pad)      output Linear bias, zero-padded
#   out_ref   : (B, O_pad)
#   action / pos_idx are static Python tuples (the shift-reduce schedule).
# ----------------------------------------------------------------------------
def fused_forward_kernel(x_ref, wih_ref, whh_ref, b_ref,
                         wih_c_ref, whh_c_ref, bc_ref,
                         wmod_ref, bmod_ref, wout_ref, bout_ref,
                         out_ref, *, T, B, H2, H, action, pos_idx):
    f32 = jnp.float32
    G = 4 * H2

    # ---- BiLSTM encoder -----------------------------------------------------
    # Hoisted input projection: one matmul for both directions, all timesteps.
    proj = (jnp.dot(x_ref[...], wih_ref[...], preferred_element_type=f32)
            + b_ref[...])                                      # (T*B, 8*H2)

    whh = whh_ref[...]                                         # hoisted loads
    h_f = jnp.zeros((B, H2), f32)
    c_f = jnp.zeros((B, H2), f32)
    h_b = jnp.zeros((B, H2), f32)
    c_b = jnp.zeros((B, H2), f32)
    outs_f = [None] * T
    outs_b = [None] * T
    for t in range(T):                                         # T small: unroll
        s = T - 1 - t
        # One block-diagonal recurrence matmul per step for BOTH directions.
        h_cat = jnp.concatenate([h_f, h_b], axis=1)            # (B, 2*H2)
        g_hh = jnp.dot(h_cat, whh, preferred_element_type=f32)  # (B, 8*H2)
        gf = proj[t * B:(t + 1) * B, :G] + g_hh[:, :G]
        gb = proj[s * B:(s + 1) * B, G:] + g_hh[:, G:]
        h_f, c_f = _apply_gates(gf, c_f, H2)
        h_b, c_b = _apply_gates(gb, c_b, H2)
        outs_f[t] = h_f
        outs_b[s] = h_b

    # ---- shift-reduce loop (static schedule, stack is kernel-local) --------
    wih_c = wih_c_ref[...]
    whh_c = whh_c_ref[...]
    bc = bc_ref[...]
    stack = []
    count = 0
    for i, a in enumerate(action):
        if a == 0:
            # PyTorch bidirectional layout: [forward | backward] feature concat.
            stack.append(jnp.concatenate([outs_f[count], outs_b[count]],
                                         axis=-1))             # (B, H)
            count += 1
        else:
            k = a
            # Pop order matters: top of stack is fed to the LSTMCell first.
            popped = [stack.pop() for _ in range(k)]
            inp = jnp.concatenate(popped, axis=0)               # (k*B, H)
            # Input projection for all k LSTMCell steps in one matmul.
            pc = (jnp.dot(inp, wih_c, preferred_element_type=f32) + bc)
            h = jnp.zeros((B, H), f32)
            c = jnp.zeros((B, H), f32)
            for j in range(k):                                  # k tiny: unroll
                gates = pc[j * B:(j + 1) * B, :] + jnp.dot(
                    h, whh_c, preferred_element_type=f32)
                h, c = _apply_gates(gates, c, H)
            # Fused module-network linear (static module index).
            m = pos_idx[i]
            stack.append(jnp.dot(h, wmod_ref[m], preferred_element_type=f32)
                         + bmod_ref[m])

    # ---- output linear epilogue (lane-dense, zero-padded width) ------------
    out_ref[...] = (jnp.dot(stack[-1], wout_ref[...],
                            preferred_element_type=f32)
                    + bout_ref[...]).astype(out_ref.dtype)


@functools.lru_cache(maxsize=None)
def _fused_call(T, B_pad, E, H2, H, O_pad, action, pos_idx):
    kernel = functools.partial(fused_forward_kernel, T=T, B=B_pad, H2=H2, H=H,
                               action=action, pos_idx=pos_idx)
    return pl.pallas_call(
        kernel,
        out_shape=jax.ShapeDtypeStruct((B_pad, O_pad), jnp.float32),
        in_specs=[_VMEM] * 11,
        out_specs=_VMEM,
    )


# ----------------------------------------------------------------------------
# Parameter construction (deterministic, shapes match the PyTorch module)
# ----------------------------------------------------------------------------
def init_params(key, vocab_size, embedding_size, hidden_size, output_size,
                module_size):
    assert hidden_size % 2 == 0, "bidirectional LSTM needs even hidden_size"
    H2 = hidden_size // 2
    H = hidden_size
    keys = iter(jax.random.split(key, 64))

    def rnd(shape, scale=0.1):
        return scale * jax.random.normal(next(keys), shape, dtype=jnp.float32)

    def lstm_params(in_dim, h_dim):
        wih = rnd((4 * h_dim, in_dim))
        whh = rnd((4 * h_dim, h_dim))
        b_ih = rnd((4 * h_dim,))
        b_hh = rnd((4 * h_dim,))
        # pre-transpose weights; fuse the two PyTorch biases
        return dict(wih_t=wih.T, whh_t=whh.T,
                    b=(b_ih + b_hh).reshape(1, 4 * h_dim))

    fwd = lstm_params(embedding_size, H2)
    bwd = lstm_params(embedding_size, H2)

    # Block-diagonal recurrent weight: [h_f | h_b] @ whh_bd = [gates_f | gates_b]
    whh_bd = jnp.zeros((2 * H2, 8 * H2), jnp.float32)
    whh_bd = whh_bd.at[:H2, :4 * H2].set(fwd['whh_t'])
    whh_bd = whh_bd.at[H2:, 4 * H2:].set(bwd['whh_t'])

    # Output layer, zero-padded to a 128-lane output width (sliced in wrapper).
    O_pad = _round_up(max(output_size, 128), 128)
    w_out = rnd((output_size, H))                 # PyTorch (out, in) layout
    b_out = rnd((output_size,))
    w_out_t_pad = jnp.zeros((H, O_pad), jnp.float32).at[:, :output_size].set(w_out.T)
    b_out_pad = jnp.zeros((1, O_pad), jnp.float32).at[0, :output_size].set(b_out)

    params = dict(
        embedding=rnd((vocab_size, embedding_size)),
        rnn=dict(
            wih_t=jnp.concatenate([fwd['wih_t'], bwd['wih_t']], axis=1),  # (E, 8*H2)
            whh_bd=whh_bd,                                                # (2*H2, 8*H2)
            b=jnp.concatenate([fwd['b'], bwd['b']], axis=1),              # (1, 8*H2)
        ),
        cell=lstm_params(H, H),
        modules_w=jnp.stack([rnd((H, H)) for _ in range(module_size)]),   # (M, H, H)
        modules_b=jnp.stack([rnd((1, H)) for _ in range(module_size)]),   # (M, 1, H)
        out=dict(w_t_pad=w_out_t_pad, b_pad=b_out_pad),
    )
    return params


# ----------------------------------------------------------------------------
# jit'ed forward factory (action / pos schedule is static, closed over).
# Mirrors Model.forward: sentence is (T, B) int32, time-major like nn.LSTM.
# ----------------------------------------------------------------------------
def make_forward(action, pos_label, pos_tag, hidden_size, output_size):
    action = tuple(int(a) for a in action)
    pos_idx = tuple(int(pos_tag[pos_label[i]]) for i in range(len(action)))
    H = hidden_size
    H2 = H // 2

    @jax.jit
    def forward(params, sentence):
        T, B = sentence.shape
        E = params['embedding'].shape[1]
        B_pad = _round_up(max(B, 8), 8)       # pad batch to full sublane tiles

        # Embedding lookup (glue, inside jit) + zero-pad batch (rows independent).
        x_emb = params['embedding'][sentence]                  # (T, B, E)
        if B_pad != B:
            x_emb = jnp.pad(x_emb, ((0, 0), (0, B_pad - B), (0, 0)))
        x_flat = x_emb.reshape(T * B_pad, E)

        rnn = params['rnn']
        cell = params['cell']
        O_pad = params['out']['w_t_pad'].shape[1]

        result = _fused_call(T, B_pad, E, H2, H, O_pad, action, pos_idx)(
            x_flat, rnn['wih_t'], rnn['whh_bd'], rnn['b'],
            cell['wih_t'], cell['whh_t'], cell['b'],
            params['modules_w'], params['modules_b'],
            params['out']['w_t_pad'], params['out']['b_pad'])

        return result[:B, :output_size]                        # (B, output_size)

    return forward


# ----------------------------------------------------------------------------
if __name__ == "__main__":
    # Small, forward-consistent shapes.
    vocab_size = 50
    embedding_size = 32
    hidden_size = 32          # must be even (BiLSTM uses hidden_size // 2)
    output_size = 8
    batch = 2
    seq_len = 4
    pos_tag = [0, 1, 2]       # maps pos labels -> module_network index
    module_size = len(pos_tag)

    key = jax.random.PRNGKey(0)
    pkey, skey = jax.random.split(key)
    params = init_params(pkey, vocab_size, embedding_size, hidden_size,
                         output_size, module_size)

    # sentence: (T, B) word indices, time-major.
    sentence = jax.random.randint(skey, (seq_len, batch), 0, vocab_size,
                                  dtype=jnp.int32)

    # Valid shift-reduce action sequence (0 = shift, k>0 = reduce k items).
    action = [0, 0, 2, 0, 0, 2, 2]
    pos_label = [0, 0, 1, 0, 0, 2, 0]   # only entries at reduce steps matter

    forward = make_forward(action, pos_label, pos_tag, hidden_size, output_size)
    result = forward(params, sentence)
    result = jax.block_until_ready(result)
    assert result.shape == (batch, output_size)
    assert result.dtype == jnp.float32
    print("KERNEL_OK")
</pallas_src>

<mosaic_0001>
module attributes {stable_mosaic.version = 11 : i64} {
  func.func @fused_forward_kernel(%arg0: memref<32x32xf32, #tpu.memory_space<vmem>>, %arg1: memref<32x128xf32, #tpu.memory_space<vmem>>, %arg2: memref<32x128xf32, #tpu.memory_space<vmem>>, %arg3: memref<1x128xf32, #tpu.memory_space<vmem>>, %arg4: memref<32x128xf32, #tpu.memory_space<vmem>>, %arg5: memref<32x128xf32, #tpu.memory_space<vmem>>, %arg6: memref<1x128xf32, #tpu.memory_space<vmem>>, %arg7: memref<3x32x32xf32, #tpu.memory_space<vmem>>, %arg8: memref<3x1x32xf32, #tpu.memory_space<vmem>>, %arg9: memref<32x128xf32, #tpu.memory_space<vmem>>, %arg10: memref<1x128xf32, #tpu.memory_space<vmem>>, %arg11: memref<8x128xf32, #tpu.memory_space<vmem>>) attributes {dimension_semantics = [], scalar_prefetch = 0 : i64, scratch_operands = 0 : i64, tpu.core_type = #tpu.core_type<tc>} {
    %c0 = arith.constant 0 : index
    %c0_0 = arith.constant 0 : index
    %0 = vector.load %arg0[%c0, %c0_0] : memref<32x32xf32, #tpu.memory_space<vmem>>, vector<32x32xf32>
    %c0_1 = arith.constant 0 : index
    %c0_2 = arith.constant 0 : index
    %1 = vector.load %arg1[%c0_1, %c0_2] : memref<32x128xf32, #tpu.memory_space<vmem>>, vector<32x128xf32>
    %cst = arith.constant dense<0.000000e+00> : vector<32x128xf32>
    %2 = tpu.matmul %0, %1, %cst {dimension_numbers = #tpu.dot_dimension_numbers<[1], [0], [0], [1], [0, 0, 1, 1], [], []>} : vector<32x32xf32>, vector<32x128xf32>, vector<32x128xf32> -> vector<32x128xf32>
    %c0_3 = arith.constant 0 : index
    %c0_4 = arith.constant 0 : index
    %3 = vector.load %arg3[%c0_3, %c0_4] : memref<1x128xf32, #tpu.memory_space<vmem>>, vector<1x128xf32>
    %4 = vector.broadcast %3 : vector<1x128xf32> to vector<32x128xf32>
    %5 = arith.addf %2, %4 : vector<32x128xf32>
    %c0_5 = arith.constant 0 : index
    %c0_6 = arith.constant 0 : index
    %6 = vector.load %arg2[%c0_5, %c0_6] : memref<32x128xf32, #tpu.memory_space<vmem>>, vector<32x128xf32>
    %cst_7 = arith.constant 0.000000e+00 : f32
    %7 = vector.broadcast %cst_7 : f32 to vector<8x16xf32>
    %cst_8 = arith.constant 0.000000e+00 : f32
    %8 = vector.broadcast %cst_8 : f32 to vector<8x16xf32>
    %cst_9 = arith.constant 0.000000e+00 : f32
    %9 = vector.broadcast %cst_9 : f32 to vector<8x16xf32>
    %cst_10 = arith.constant 0.000000e+00 : f32
    %10 = vector.broadcast %cst_10 : f32 to vector<8x16xf32>
    %11 = tpu.concatenate %7, %9 in 1 : vector<8x16xf32>, vector<8x16xf32> -> vector<8x32xf32>
    %cst_11 = arith.constant dense<0.000000e+00> : vector<8x128xf32>
    %12 = tpu.matmul %11, %6, %cst_11 {dimension_numbers = #tpu.dot_dimension_numbers<[1], [0], [0], [1], [0, 0, 1, 1], [], []>} : vector<8x32xf32>, vector<32x128xf32>, vector<8x128xf32> -> vector<8x128xf32>
    %13 = vector.extract_strided_slice %5 {offsets = [0, 0], sizes = [8, 64], strides = [1, 1]} : vector<32x128xf32> to vector<8x64xf32>
    %14 = vector.extract_strided_slice %12 {offsets = [0, 0], sizes = [8, 64], strides = [1, 1]} : vector<8x128xf32> to vector<8x64xf32>
    %15 = arith.addf %13, %14 : vector<8x64xf32>
    %16 = vector.extract_strided_slice %5 {offsets = [24, 64], sizes = [8, 64], strides = [1, 1]} : vector<32x128xf32> to vector<8x64xf32>
    %17 = vector.extract_strided_slice %12 {offsets = [0, 64], sizes = [8, 64], strides = [1, 1]} : vector<8x128xf32> to vector<8x64xf32>
    %18 = arith.addf %16, %17 : vector<8x64xf32>
    %19 = vector.extract_strided_slice %15 {offsets = [0, 0], sizes = [8, 16], strides = [1, 1]} : vector<8x64xf32> to vector<8x16xf32>
    %20 = arith.negf %19 : vector<8x16xf32>
    %21 = math.exp %20 : vector<8x16xf32>
    %cst_12 = arith.constant 1.000000e+00 : f32
    %22 = vector.broadcast %cst_12 : f32 to vector<8x16xf32>
    %23 = arith.addf %22, %21 : vector<8x16xf32>
    %24 = arith.divf %22, %23 : vector<8x16xf32>
    %25 = vector.extract_strided_slice %15 {offsets = [0, 16], sizes = [8, 16], strides = [1, 1]} : vector<8x64xf32> to vector<8x16xf32>
    %26 = arith.negf %25 : vector<8x16xf32>
    %27 = math.exp %26 : vector<8x16xf32>
    %cst_13 = arith.constant 1.000000e+00 : f32
    %28 = vector.broadcast %cst_13 : f32 to vector<8x16xf32>
    %29 = arith.addf %28, %27 : vector<8x16xf32>
    %30 = arith.divf %28, %29 : vector<8x16xf32>
    %31 = vector.extract_strided_slice %15 {offsets = [0, 32], sizes = [8, 16], strides = [1, 1]} : vector<8x64xf32> to vector<8x16xf32>
    %32 = math.tanh %31 : vector<8x16xf32>
    %33 = vector.extract_strided_slice %15 {offsets = [0, 48], sizes = [8, 16], strides = [1, 1]} : vector<8x64xf32> to vector<8x16xf32>
    %34 = arith.negf %33 : vector<8x16xf32>
    %35 = math.exp %34 : vector<8x16xf32>
    %cst_14 = arith.constant 1.000000e+00 : f32
    %36 = vector.broadcast %cst_14 : f32 to vector<8x16xf32>
    %37 = arith.addf %36, %35 : vector<8x16xf32>
    %38 = arith.divf %36, %37 : vector<8x16xf32>
    %39 = arith.mulf %30, %8 : vector<8x16xf32>
    %40 = arith.mulf %24, %32 : vector<8x16xf32>
    %41 = arith.addf %39, %40 : vector<8x16xf32>
    %42 = math.tanh %41 : vector<8x16xf32>
    %43 = arith.mulf %38, %42 : vector<8x16xf32>
    %44 = vector.extract_strided_slice %18 {offsets = [0, 0], sizes = [8, 16], strides = [1, 1]} : vector<8x64xf32> to vector<8x16xf32>
    %45 = arith.negf %44 : vector<8x16xf32>
    %46 = math.exp %45 : vector<8x16xf32>
    %cst_15 = arith.constant 1.000000e+00 : f32
    %47 = vector.broadcast %cst_15 : f32 to vector<8x16xf32>
    %48 = arith.addf %47, %46 : vector<8x16xf32>
    %49 = arith.divf %47, %48 : vector<8x16xf32>
    %50 = vector.extract_strided_slice %18 {offsets = [0, 16], sizes = [8, 16], strides = [1, 1]} : vector<8x64xf32> to vector<8x16xf32>
    %51 = arith.negf %50 : vector<8x16xf32>
    %52 = math.exp %51 : vector<8x16xf32>
    %cst_16 = arith.constant 1.000000e+00 : f32
    %53 = vector.broadcast %cst_16 : f32 to vector<8x16xf32>
    %54 = arith.addf %53, %52 : vector<8x16xf32>
    %55 = arith.divf %53, %54 : vector<8x16xf32>
    %56 = vector.extract_strided_slice %18 {offsets = [0, 32], sizes = [8, 16], strides = [1, 1]} : vector<8x64xf32> to vector<8x16xf32>
    %57 = math.tanh %56 : vector<8x16xf32>
    %58 = vector.extract_strided_slice %18 {offsets = [0, 48], sizes = [8, 16], strides = [1, 1]} : vector<8x64xf32> to vector<8x16xf32>
    %59 = arith.negf %58 : vector<8x16xf32>
    %60 = math.exp %59 : vector<8x16xf32>
    %cst_17 = arith.constant 1.000000e+00 : f32
    %61 = vector.broadcast %cst_17 : f32 to vector<8x16xf32>
    %62 = arith.addf %61, %60 : vector<8x16xf32>
    %63 = arith.divf %61, %62 : vector<8x16xf32>
    %64 = arith.mulf %55, %10 : vector<8x16xf32>
    %65 = arith.mulf %49, %57 : vector<8x16xf32>
    %66 = arith.addf %64, %65 : vector<8x16xf32>
    %67 = math.tanh %66 : vector<8x16xf32>
    %68 = arith.mulf %63, %67 : vector<8x16xf32>
    %69 = tpu.concatenate %43, %68 in 1 : vector<8x16xf32>, vector<8x16xf32> -> vector<8x32xf32>
    %cst_18 = arith.constant dense<0.000000e+00> : vector<8x128xf32>
    %70 = tpu.matmul %69, %6, %cst_18 {dimension_numbers = #tpu.dot_dimension_numbers<[1], [0], [0], [1], [0, 0, 1, 1], [], []>} : vector<8x32xf32>, vector<32x128xf32>, vector<8x128xf32> -> vector<8x128xf32>
    %71 = vector.extract_strided_slice %5 {offsets = [8, 0], sizes = [8, 64], strides = [1, 1]} : vector<32x128xf32> to vector<8x64xf32>
    %72 = vector.extract_strided_slice %70 {offsets = [0, 0], sizes = [8, 64], strides = [1, 1]} : vector<8x128xf32> to vector<8x64xf32>
    %73 = arith.addf %71, %72 : vector<8x64xf32>
    %74 = vector.extract_strided_slice %5 {offsets = [16, 64], sizes = [8, 64], strides = [1, 1]} : vector<32x128xf32> to vector<8x64xf32>
    %75 = vector.extract_strided_slice %70 {offsets = [0, 64], sizes = [8, 64], strides = [1, 1]} : vector<8x128xf32> to vector<8x64xf32>
    %76 = arith.addf %74, %75 : vector<8x64xf32>
    %77 = vector.extract_strided_slice %73 {offsets = [0, 0], sizes = [8, 16], strides = [1, 1]} : vector<8x64xf32> to vector<8x16xf32>
    %78 = arith.negf %77 : vector<8x16xf32>
    %79 = math.exp %78 : vector<8x16xf32>
    %cst_19 = arith.constant 1.000000e+00 : f32
    %80 = vector.broadcast %cst_19 : f32 to vector<8x16xf32>
    %81 = arith.addf %80, %79 : vector<8x16xf32>
    %82 = arith.divf %80, %81 : vector<8x16xf32>
    %83 = vector.extract_strided_slice %73 {offsets = [0, 16], sizes = [8, 16], strides = [1, 1]} : vector<8x64xf32> to vector<8x16xf32>
    %84 = arith.negf %83 : vector<8x16xf32>
    %85 = math.exp %84 : vector<8x16xf32>
    %cst_20 = arith.constant 1.000000e+00 : f32
    %86 = vector.broadcast %cst_20 : f32 to vector<8x16xf32>
    %87 = arith.addf %86, %85 : vector<8x16xf32>
    %88 = arith.divf %86, %87 : vector<8x16xf32>
    %89 = vector.extract_strided_slice %73 {offsets = [0, 32], sizes = [8, 16], strides = [1, 1]} : vector<8x64xf32> to vector<8x16xf32>
    %90 = math.tanh %89 : vector<8x16xf32>
    %91 = vector.extract_strided_slice %73 {offsets = [0, 48], sizes = [8, 16], strides = [1, 1]} : vector<8x64xf32> to vector<8x16xf32>
    %92 = arith.negf %91 : vector<8x16xf32>
    %93 = math.exp %92 : vector<8x16xf32>
    %cst_21 = arith.constant 1.000000e+00 : f32
    %94 = vector.broadcast %cst_21 : f32 to vector<8x16xf32>
    %95 = arith.addf %94, %93 : vector<8x16xf32>
    %96 = arith.divf %94, %95 : vector<8x16xf32>
    %97 = arith.mulf %88, %41 : vector<8x16xf32>
    %98 = arith.mulf %82, %90 : vector<8x16xf32>
    %99 = arith.addf %97, %98 : vector<8x16xf32>
    %100 = math.tanh %99 : vector<8x16xf32>
    %101 = arith.mulf %96, %100 : vector<8x16xf32>
    %102 = vector.extract_strided_slice %76 {offsets = [0, 0], sizes = [8, 16], strides = [1, 1]} : vector<8x64xf32> to vector<8x16xf32>
    %103 = arith.negf %102 : vector<8x16xf32>
    %104 = math.exp %103 : vector<8x16xf32>
    %cst_22 = arith.constant 1.000000e+00 : f32
    %105 = vector.broadcast %cst_22 : f32 to vector<8x16xf32>
    %106 = arith.addf %105, %104 : vector<8x16xf32>
    %107 = arith.divf %105, %106 : vector<8x16xf32>
    %108 = vector.extract_strided_slice %76 {offsets = [0, 16], sizes = [8, 16], strides = [1, 1]} : vector<8x64xf32> to vector<8x16xf32>
    %109 = arith.negf %108 : vector<8x16xf32>
    %110 = math.exp %109 : vector<8x16xf32>
    %cst_23 = arith.constant 1.000000e+00 : f32
    %111 = vector.broadcast %cst_23 : f32 to vector<8x16xf32>
    %112 = arith.addf %111, %110 : vector<8x16xf32>
    %113 = arith.divf %111, %112 : vector<8x16xf32>
    %114 = vector.extract_strided_slice %76 {offsets = [0, 32], sizes = [8, 16], strides = [1, 1]} : vector<8x64xf32> to vector<8x16xf32>
    %115 = math.tanh %114 : vector<8x16xf32>
    %116 = vector.extract_strided_slice %76 {offsets = [0, 48], sizes = [8, 16], strides = [1, 1]} : vector<8x64xf32> to vector<8x16xf32>
    %117 = arith.negf %116 : vector<8x16xf32>
    %118 = math.exp %117 : vector<8x16xf32>
    %cst_24 = arith.constant 1.000000e+00 : f32
    %119 = vector.broadcast %cst_24 : f32 to vector<8x16xf32>
    %120 = arith.addf %119, %118 : vector<8x16xf32>
    %121 = arith.divf %119, %120 : vector<8x16xf32>
    %122 = arith.mulf %113, %66 : vector<8x16xf32>
    %123 = arith.mulf %107, %115 : vector<8x16xf32>
    %124 = arith.addf %122, %123 : vector<8x16xf32>
    %125 = math.tanh %124 : vector<8x16xf32>
    %126 = arith.mulf %121, %125 : vector<8x16xf32>
    %127 = tpu.concatenate %101, %126 in 1 : vector<8x16xf32>, vector<8x16xf32> -> vector<8x32xf32>
    %cst_25 = arith.constant dense<0.000000e+00> : vector<8x128xf32>
    %128 = tpu.matmul %127, %6, %cst_25 {dimension_numbers = #tpu.dot_dimension_numbers<[1], [0], [0], [1], [0, 0, 1, 1], [], []>} : vector<8x32xf32>, vector<32x128xf32>, vector<8x128xf32> -> vector<8x128xf32>
    %129 = vector.extract_strided_slice %5 {offsets = [16, 0], sizes = [8, 64], strides = [1, 1]} : vector<32x128xf32> to vector<8x64xf32>
    %130 = vector.extract_strided_slice %128 {offsets = [0, 0], sizes = [8, 64], strides = [1, 1]} : vector<8x128xf32> to vector<8x64xf32>
    %131 = arith.addf %129, %130 : vector<8x64xf32>
    %132 = vector.extract_strided_slice %5 {offsets = [8, 64], sizes = [8, 64], strides = [1, 1]} : vector<32x128xf32> to vector<8x64xf32>
    %133 = vector.extract_strided_slice %128 {offsets = [0, 64], sizes = [8, 64], strides = [1, 1]} : vector<8x128xf32> to vector<8x64xf32>
    %134 = arith.addf %132, %133 : vector<8x64xf32>
    %135 = vector.extract_strided_slice %131 {offsets = [0, 0], sizes = [8, 16], strides = [1, 1]} : vector<8x64xf32> to vector<8x16xf32>
    %136 = arith.negf %135 : vector<8x16xf32>
    %137 = math.exp %136 : vector<8x16xf32>
    %cst_26 = arith.constant 1.000000e+00 : f32
    %138 = vector.broadcast %cst_26 : f32 to vector<8x16xf32>
    %139 = arith.addf %138, %137 : vector<8x16xf32>
    %140 = arith.divf %138, %139 : vector<8x16xf32>
    %141 = vector.extract_strided_slice %131 {offsets = [0, 16], sizes = [8, 16], strides = [1, 1]} : vector<8x64xf32> to vector<8x16xf32>
    %142 = arith.negf %141 : vector<8x16xf32>
    %143 = math.exp %142 : vector<8x16xf32>
    %cst_27 = arith.constant 1.000000e+00 : f32
    %144 = vector.broadcast %cst_27 : f32 to vector<8x16xf32>
    %145 = arith.addf %144, %143 : vector<8x16xf32>
    %146 = arith.divf %144, %145 : vector<8x16xf32>
    %147 = vector.extract_strided_slice %131 {offsets = [0, 32], sizes = [8, 16], strides = [1, 1]} : vector<8x64xf32> to vector<8x16xf32>
    %148 = math.tanh %147 : vector<8x16xf32>
    %149 = vector.extract_strided_slice %131 {offsets = [0, 48], sizes = [8, 16], strides = [1, 1]} : vector<8x64xf32> to vector<8x16xf32>
    %150 = arith.negf %149 : vector<8x16xf32>
    %151 = math.exp %150 : vector<8x16xf32>
    %cst_28 = arith.constant 1.000000e+00 : f32
    %152 = vector.broadcast %cst_28 : f32 to vector<8x16xf32>
    %153 = arith.addf %152, %151 : vector<8x16xf32>
    %154 = arith.divf %152, %153 : vector<8x16xf32>
    %155 = arith.mulf %146, %99 : vector<8x16xf32>
    %156 = arith.mulf %140, %148 : vector<8x16xf32>
    %157 = arith.addf %155, %156 : vector<8x16xf32>
    %158 = math.tanh %157 : vector<8x16xf32>
    %159 = arith.mulf %154, %158 : vector<8x16xf32>
    %160 = vector.extract_strided_slice %134 {offsets = [0, 0], sizes = [8, 16], strides = [1, 1]} : vector<8x64xf32> to vector<8x16xf32>
    %161 = arith.negf %160 : vector<8x16xf32>
    %162 = math.exp %161 : vector<8x16xf32>
    %cst_29 = arith.constant 1.000000e+00 : f32
    %163 = vector.broadcast %cst_29 : f32 to vector<8x16xf32>
    %164 = arith.addf %163, %162 : vector<8x16xf32>
    %165 = arith.divf %163, %164 : vector<8x16xf32>
    %166 = vector.extract_strided_slice %134 {offsets = [0, 16], sizes = [8, 16], strides = [1, 1]} : vector<8x64xf32> to vector<8x16xf32>
    %167 = arith.negf %166 : vector<8x16xf32>
    %168 = math.exp %167 : vector<8x16xf32>
    %cst_30 = arith.constant 1.000000e+00 : f32
    %169 = vector.broadcast %cst_30 : f32 to vector<8x16xf32>
    %170 = arith.addf %169, %168 : vector<8x16xf32>
    %171 = arith.divf %169, %170 : vector<8x16xf32>
    %172 = vector.extract_strided_slice %134 {offsets = [0, 32], sizes = [8, 16], strides = [1, 1]} : vector<8x64xf32> to vector<8x16xf32>
    %173 = math.tanh %172 : vector<8x16xf32>
    %174 = vector.extract_strided_slice %134 {offsets = [0, 48], sizes = [8, 16], strides = [1, 1]} : vector<8x64xf32> to vector<8x16xf32>
    %175 = arith.negf %174 : vector<8x16xf32>
    %176 = math.exp %175 : vector<8x16xf32>
    %cst_31 = arith.constant 1.000000e+00 : f32
    %177 = vector.broadcast %cst_31 : f32 to vector<8x16xf32>
    %178 = arith.addf %177, %176 : vector<8x16xf32>
    %179 = arith.divf %177, %178 : vector<8x16xf32>
    %180 = arith.mulf %171, %124 : vector<8x16xf32>
    %181 = arith.mulf %165, %173 : vector<8x16xf32>
    %182 = arith.addf %180, %181 : vector<8x16xf32>
    %183 = math.tanh %182 : vector<8x16xf32>
    %184 = arith.mulf %179, %183 : vector<8x16xf32>
    %185 = tpu.concatenate %159, %184 in 1 : vector<8x16xf32>, vector<8x16xf32> -> vector<8x32xf32>
    %cst_32 = arith.constant dense<0.000000e+00> : vector<8x128xf32>
    %186 = tpu.matmul %185, %6, %cst_32 {dimension_numbers = #tpu.dot_dimension_numbers<[1], [0], [0], [1], [0, 0, 1, 1], [], []>} : vector<8x32xf32>, vector<32x128xf32>, vector<8x128xf32> -> vector<8x128xf32>
    %187 = vector.extract_strided_slice %5 {offsets = [24, 0], sizes = [8, 64], strides = [1, 1]} : vector<32x128xf32> to vector<8x64xf32>
    %188 = vector.extract_strided_slice %186 {offsets = [0, 0], sizes = [8, 64], strides = [1, 1]} : vector<8x128xf32> to vector<8x64xf32>
    %189 = arith.addf %187, %188 : vector<8x64xf32>
    %190 = vector.extract_strided_slice %5 {offsets = [0, 64], sizes = [8, 64], strides = [1, 1]} : vector<32x128xf32> to vector<8x64xf32>
    %191 = vector.extract_strided_slice %186 {offsets = [0, 64], sizes = [8, 64], strides = [1, 1]} : vector<8x128xf32> to vector<8x64xf32>
    %192 = arith.addf %190, %191 : vector<8x64xf32>
    %193 = vector.extract_strided_slice %189 {offsets = [0, 0], sizes = [8, 16], strides = [1, 1]} : vector<8x64xf32> to vector<8x16xf32>
    %194 = arith.negf %193 : vector<8x16xf32>
    %195 = math.exp %194 : vector<8x16xf32>
    %cst_33 = arith.constant 1.000000e+00 : f32
    %196 = vector.broadcast %cst_33 : f32 to vector<8x16xf32>
    %197 = arith.addf %196, %195 : vector<8x16xf32>
    %198 = arith.divf %196, %197 : vector<8x16xf32>
    %199 = vector.extract_strided_slice %189 {offsets = [0, 16], sizes = [8, 16], strides = [1, 1]} : vector<8x64xf32> to vector<8x16xf32>
    %200 = arith.negf %199 : vector<8x16xf32>
    %201 = math.exp %200 : vector<8x16xf32>
    %cst_34 = arith.constant 1.000000e+00 : f32
    %202 = vector.broadcast %cst_34 : f32 to vector<8x16xf32>
    %203 = arith.addf %202, %201 : vector<8x16xf32>
    %204 = arith.divf %202, %203 : vector<8x16xf32>
    %205 = vector.extract_strided_slice %189 {offsets = [0, 32], sizes = [8, 16], strides = [1, 1]} : vector<8x64xf32> to vector<8x16xf32>
    %206 = math.tanh %205 : vector<8x16xf32>
    %207 = vector.extract_strided_slice %189 {offsets = [0, 48], sizes = [8, 16], strides = [1, 1]} : vector<8x64xf32> to vector<8x16xf32>
    %208 = arith.negf %207 : vector<8x16xf32>
    %209 = math.exp %208 : vector<8x16xf32>
    %cst_35 = arith.constant 1.000000e+00 : f32
    %210 = vector.broadcast %cst_35 : f32 to vector<8x16xf32>
    %211 = arith.addf %210, %209 : vector<8x16xf32>
    %212 = arith.divf %210, %211 : vector<8x16xf32>
    %213 = arith.mulf %204, %157 : vector<8x16xf32>
    %214 = arith.mulf %198, %206 : vector<8x16xf32>
    %215 = arith.addf %213, %214 : vector<8x16xf32>
    %216 = math.tanh %215 : vector<8x16xf32>
    %217 = arith.mulf %212, %216 : vector<8x16xf32>
    %218 = vector.extract_strided_slice %192 {offsets = [0, 0], sizes = [8, 16], strides = [1, 1]} : vector<8x64xf32> to vector<8x16xf32>
    %219 = arith.negf %218 : vector<8x16xf32>
    %220 = math.exp %219 : vector<8x16xf32>
    %cst_36 = arith.constant 1.000000e+00 : f32
    %221 = vector.broadcast %cst_36 : f32 to vector<8x16xf32>
    %222 = arith.addf %221, %220 : vector<8x16xf32>
    %223 = arith.divf %221, %222 : vector<8x16xf32>
    %224 = vector.extract_strided_slice %192 {offsets = [0, 16], sizes = [8, 16], strides = [1, 1]} : vector<8x64xf32> to vector<8x16xf32>
    %225 = arith.negf %224 : vector<8x16xf32>
    %226 = math.exp %225 : vector<8x16xf32>
    %cst_37 = arith.constant 1.000000e+00 : f32
    %227 = vector.broadcast %cst_37 : f32 to vector<8x16xf32>
    %228 = arith.addf %227, %226 : vector<8x16xf32>
    %229 = arith.divf %227, %228 : vector<8x16xf32>
    %230 = vector.extract_strided_slice %192 {offsets = [0, 32], sizes = [8, 16], strides = [1, 1]} : vector<8x64xf32> to vector<8x16xf32>
    %231 = math.tanh %230 : vector<8x16xf32>
    %232 = vector.extract_strided_slice %192 {offsets = [0, 48], sizes = [8, 16], strides = [1, 1]} : vector<8x64xf32> to vector<8x16xf32>
    %233 = arith.negf %232 : vector<8x16xf32>
    %234 = math.exp %233 : vector<8x16xf32>
    %cst_38 = arith.constant 1.000000e+00 : f32
    %235 = vector.broadcast %cst_38 : f32 to vector<8x16xf32>
    %236 = arith.addf %235, %234 : vector<8x16xf32>
    %237 = arith.divf %235, %236 : vector<8x16xf32>
    %238 = arith.mulf %229, %182 : vector<8x16xf32>
    %239 = arith.mulf %223, %231 : vector<8x16xf32>
    %240 = arith.addf %238, %239 : vector<8x16xf32>
    %241 = math.tanh %240 : vector<8x16xf32>
    %242 = arith.mulf %237, %241 : vector<8x16xf32>
    %c0_39 = arith.constant 0 : index
    %c0_40 = arith.constant 0 : index
    %243 = vector.load %arg4[%c0_39, %c0_40] : memref<32x128xf32, #tpu.memory_space<vmem>>, vector<32x128xf32>
    %c0_41 = arith.constant 0 : index
    %c0_42 = arith.constant 0 : index
    %244 = vector.load %arg5[%c0_41, %c0_42] : memref<32x128xf32, #tpu.memory_space<vmem>>, vector<32x128xf32>
    %c0_43 = arith.constant 0 : index
    %c0_44 = arith.constant 0 : index
    %245 = vector.load %arg6[%c0_43, %c0_44] : memref<1x128xf32, #tpu.memory_space<vmem>>, vector<1x128xf32>
    %246 = tpu.concatenate %43, %242 in 1 : vector<8x16xf32>, vector<8x16xf32> -> vector<8x32xf32>
    %247 = tpu.concatenate %101, %184 in 1 : vector<8x16xf32>, vector<8x16xf32> -> vector<8x32xf32>
    %248 = tpu.concatenate %247, %246 in 0 : vector<8x32xf32>, vector<8x32xf32> -> vector<16x32xf32>
    %cst_45 = arith.constant dense<0.000000e+00> : vector<16x128xf32>
    %249 = tpu.matmul %248, %243, %cst_45 {dimension_numbers = #tpu.dot_dimension_numbers<[1], [0], [0], [1], [0, 0, 1, 1], [], []>} : vector<16x32xf32>, vector<32x128xf32>, vector<16x128xf32> -> vector<16x128xf32>
    %250 = vector.broadcast %245 : vector<1x128xf32> to vector<16x128xf32>
    %251 = arith.addf %249, %250 : vector<16x128xf32>
    %cst_46 = arith.constant 0.000000e+00 : f32
    %252 = vector.broadcast %cst_46 : f32 to vector<8x32xf32>
    %cst_47 = arith.constant 0.000000e+00 : f32
    %253 = vector.broadcast %cst_47 : f32 to vector<8x32xf32>
    %254 = vector.extract_strided_slice %251 {offsets = [0, 0], sizes = [8, 128], strides = [1, 1]} : vector<16x128xf32> to vector<8x128xf32>
    %cst_48 = arith.constant dense<0.000000e+00> : vector<8x128xf32>
    %255 = tpu.matmul %252, %244, %cst_48 {dimension_numbers = #tpu.dot_dimension_numbers<[1], [0], [0], [1], [0, 0, 1, 1], [], []>} : vector<8x32xf32>, vector<32x128xf32>, vector<8x128xf32> -> vector<8x128xf32>
    %256 = arith.addf %254, %255 : vector<8x128xf32>
    %257 = vector.extract_strided_slice %256 {offsets = [0, 0], sizes = [8, 32], strides = [1, 1]} : vector<8x128xf32> to vector<8x32xf32>
    %258 = arith.negf %257 : vector<8x32xf32>
    %259 = math.exp %258 : vector<8x32xf32>
    %cst_49 = arith.constant 1.000000e+00 : f32
    %260 = vector.broadcast %cst_49 : f32 to vector<8x32xf32>
    %261 = arith.addf %260, %259 : vector<8x32xf32>
    %262 = arith.divf %260, %261 : vector<8x32xf32>
    %263 = vector.extract_strided_slice %256 {offsets = [0, 32], sizes = [8, 32], strides = [1, 1]} : vector<8x128xf32> to vector<8x32xf32>
    %264 = arith.negf %263 : vector<8x32xf32>
    %265 = math.exp %264 : vector<8x32xf32>
    %cst_50 = arith.constant 1.000000e+00 : f32
    %266 = vector.broadcast %cst_50 : f32 to vector<8x32xf32>
    %267 = arith.addf %266, %265 : vector<8x32xf32>
    %268 = arith.divf %266, %267 : vector<8x32xf32>
    %269 = vector.extract_strided_slice %256 {offsets = [0, 64], sizes = [8, 32], strides = [1, 1]} : vector<8x128xf32> to vector<8x32xf32>
    %270 = math.tanh %269 : vector<8x32xf32>
    %271 = vector.extract_strided_slice %256 {offsets = [0, 96], sizes = [8, 32], strides = [1, 1]} : vector<8x128xf32> to vector<8x32xf32>
    %272 = arith.negf %271 : vector<8x32xf32>
    %273 = math.exp %272 : vector<8x32xf32>
    %cst_51 = arith.constant 1.000000e+00 : f32
    %274 = vector.broadcast %cst_51 : f32 to vector<8x32xf32>
    %275 = arith.addf %274, %273 : vector<8x32xf32>
    %276 = arith.divf %274, %275 : vector<8x32xf32>
    %277 = arith.mulf %268, %253 : vector<8x32xf32>
    %278 = arith.mulf %262, %270 : vector<8x32xf32>
    %279 = arith.addf %277, %278 : vector<8x32xf32>
    %280 = math.tanh %279 : vector<8x32xf32>
    %281 = arith.mulf %276, %280 : vector<8x32xf32>
    %282 = vector.extract_strided_slice %251 {offsets = [8, 0], sizes = [8, 128], strides = [1, 1]} : vector<16x128xf32> to vector<8x128xf32>
    %cst_52 = arith.constant dense<0.000000e+00> : vector<8x128xf32>
    %283 = tpu.matmul %281, %244, %cst_52 {dimension_numbers = #tpu.dot_dimension_numbers<[1], [0], [0], [1], [0, 0, 1, 1], [], []>} : vector<8x32xf32>, vector<32x128xf32>, vector<8x128xf32> -> vector<8x128xf32>
    %284 = arith.addf %282, %283 : vector<8x128xf32>
    %285 = vector.extract_strided_slice %284 {offsets = [0, 0], sizes = [8, 32], strides = [1, 1]} : vector<8x128xf32> to vector<8x32xf32>
    %286 = arith.negf %285 : vector<8x32xf32>
    %287 = math.exp %286 : vector<8x32xf32>
    %cst_53 = arith.constant 1.000000e+00 : f32
    %288 = vector.broadcast %cst_53 : f32 to vector<8x32xf32>
    %289 = arith.addf %288, %287 : vector<8x32xf32>
    %290 = arith.divf %288, %289 : vector<8x32xf32>
    %291 = vector.extract_strided_slice %284 {offsets = [0, 32], sizes = [8, 32], strides = [1, 1]} : vector<8x128xf32> to vector<8x32xf32>
    %292 = arith.negf %291 : vector<8x32xf32>
    %293 = math.exp %292 : vector<8x32xf32>
    %cst_54 = arith.constant 1.000000e+00 : f32
    %294 = vector.broadcast %cst_54 : f32 to vector<8x32xf32>
    %295 = arith.addf %294, %293 : vector<8x32xf32>
    %296 = arith.divf %294, %295 : vector<8x32xf32>
    %297 = vector.extract_strided_slice %284 {offsets = [0, 64], sizes = [8, 32], strides = [1, 1]} : vector<8x128xf32> to vector<8x32xf32>
    %298 = math.tanh %297 : vector<8x32xf32>
    %299 = vector.extract_strided_slice %284 {offsets = [0, 96], sizes = [8, 32], strides = [1, 1]} : vector<8x128xf32> to vector<8x32xf32>
    %300 = arith.negf %299 : vector<8x32xf32>
    %301 = math.exp %300 : vector<8x32xf32>
    %cst_55 = arith.constant 1.000000e+00 : f32
    %302 = vector.broadcast %cst_55 : f32 to vector<8x32xf32>
    %303 = arith.addf %302, %301 : vector<8x32xf32>
    %304 = arith.divf %302, %303 : vector<8x32xf32>
    %305 = arith.mulf %296, %279 : vector<8x32xf32>
    %306 = arith.mulf %290, %298 : vector<8x32xf32>
    %307 = arith.addf %305, %306 : vector<8x32xf32>
    %308 = math.tanh %307 : vector<8x32xf32>
    %309 = arith.mulf %304, %308 : vector<8x32xf32>
    %c1 = arith.constant 1 : index
    %c0_56 = arith.constant 0 : index
    %c0_57 = arith.constant 0 : index
    %310 = vector.load %arg7[%c1, %c0_56, %c0_57] : memref<3x32x32xf32, #tpu.memory_space<vmem>>, vector<1x32x32xf32>
    %311 = vector.shape_cast %310 : vector<1x32x32xf32> to vector<32x32xf32>
    %cst_58 = arith.constant dense<0.000000e+00> : vector<8x32xf32>
    %312 = tpu.matmul %309, %311, %cst_58 {dimension_numbers = #tpu.dot_dimension_numbers<[1], [0], [0], [1], [0, 0, 1, 1], [], []>} : vector<8x32xf32>, vector<32x32xf32>, vector<8x32xf32> -> vector<8x32xf32>
    %c1_59 = arith.constant 1 : index
    %c0_60 = arith.constant 0 : index
    %c0_61 = arith.constant 0 : index
    %313 = vector.load %arg8[%c1_59, %c0_60, %c0_61] : memref<3x1x32xf32, #tpu.memory_space<vmem>>, vector<1x1x32xf32>
    %314 = vector.shape_cast %313 : vector<1x1x32xf32> to vector<1x32xf32>
    %315 = vector.broadcast %314 : vector<1x32xf32> to vector<8x32xf32>
    %316 = arith.addf %312, %315 : vector<8x32xf32>
    %317 = tpu.concatenate %159, %126 in 1 : vector<8x16xf32>, vector<8x16xf32> -> vector<8x32xf32>
    %318 = tpu.concatenate %217, %68 in 1 : vector<8x16xf32>, vector<8x16xf32> -> vector<8x32xf32>
    %319 = tpu.concatenate %318, %317 in 0 : vector<8x32xf32>, vector<8x32xf32> -> vector<16x32xf32>
    %cst_62 = arith.constant dense<0.000000e+00> : vector<16x128xf32>
    %320 = tpu.matmul %319, %243, %cst_62 {dimension_numbers = #tpu.dot_dimension_numbers<[1], [0], [0], [1], [0, 0, 1, 1], [], []>} : vector<16x32xf32>, vector<32x128xf32>, vector<16x128xf32> -> vector<16x128xf32>
    %321 = vector.broadcast %245 : vector<1x128xf32> to vector<16x128xf32>
    %322 = arith.addf %320, %321 : vector<16x128xf32>
    %cst_63 = arith.constant 0.000000e+00 : f32
    %323 = vector.broadcast %cst_63 : f32 to vector<8x32xf32>
    %cst_64 = arith.constant 0.000000e+00 : f32
    %324 = vector.broadcast %cst_64 : f32 to vector<8x32xf32>
    %325 = vector.extract_strided_slice %322 {offsets = [0, 0], sizes = [8, 128], strides = [1, 1]} : vector<16x128xf32> to vector<8x128xf32>
    %cst_65 = arith.constant dense<0.000000e+00> : vector<8x128xf32>
    %326 = tpu.matmul %323, %244, %cst_65 {dimension_numbers = #tpu.dot_dimension_numbers<[1], [0], [0], [1], [0, 0, 1, 1], [], []>} : vector<8x32xf32>, vector<32x128xf32>, vector<8x128xf32> -> vector<8x128xf32>
    %327 = arith.addf %325, %326 : vector<8x128xf32>
    %328 = vector.extract_strided_slice %327 {offsets = [0, 0], sizes = [8, 32], strides = [1, 1]} : vector<8x128xf32> to vector<8x32xf32>
    %329 = arith.negf %328 : vector<8x32xf32>
    %330 = math.exp %329 : vector<8x32xf32>
    %cst_66 = arith.constant 1.000000e+00 : f32
    %331 = vector.broadcast %cst_66 : f32 to vector<8x32xf32>
    %332 = arith.addf %331, %330 : vector<8x32xf32>
    %333 = arith.divf %331, %332 : vector<8x32xf32>
    %334 = vector.extract_strided_slice %327 {offsets = [0, 32], sizes = [8, 32], strides = [1, 1]} : vector<8x128xf32> to vector<8x32xf32>
    %335 = arith.negf %334 : vector<8x32xf32>
    %336 = math.exp %335 : vector<8x32xf32>
    %cst_67 = arith.constant 1.000000e+00 : f32
    %337 = vector.broadcast %cst_67 : f32 to vector<8x32xf32>
    %338 = arith.addf %337, %336 : vector<8x32xf32>
    %339 = arith.divf %337, %338 : vector<8x32xf32>
    %340 = vector.extract_strided_slice %327 {offsets = [0, 64], sizes = [8, 32], strides = [1, 1]} : vector<8x128xf32> to vector<8x32xf32>
    %341 = math.tanh %340 : vector<8x32xf32>
    %342 = vector.extract_strided_slice %327 {offsets = [0, 96], sizes = [8, 32], strides = [1, 1]} : vector<8x128xf32> to vector<8x32xf32>
    %343 = arith.negf %342 : vector<8x32xf32>
    %344 = math.exp %343 : vector<8x32xf32>
    %cst_68 = arith.constant 1.000000e+00 : f32
    %345 = vector.broadcast %cst_68 : f32 to vector<8x32xf32>
    %346 = arith.addf %345, %344 : vector<8x32xf32>
    %347 = arith.divf %345, %346 : vector<8x32xf32>
    %348 = arith.mulf %339, %324 : vector<8x32xf32>
    %349 = arith.mulf %333, %341 : vector<8x32xf32>
    %350 = arith.addf %348, %349 : vector<8x32xf32>
    %351 = math.tanh %350 : vector<8x32xf32>
    %352 = arith.mulf %347, %351 : vector<8x32xf32>
    %353 = vector.extract_strided_slice %322 {offsets = [8, 0], sizes = [8, 128], strides = [1, 1]} : vector<16x128xf32> to vector<8x128xf32>
    %cst_69 = arith.constant dense<0.000000e+00> : vector<8x128xf32>
    %354 = tpu.matmul %352, %244, %cst_69 {dimension_numbers = #tpu.dot_dimension_numbers<[1], [0], [0], [1], [0, 0, 1, 1], [], []>} : vector<8x32xf32>, vector<32x128xf32>, vector<8x128xf32> -> vector<8x128xf32>
    %355 = arith.addf %353, %354 : vector<8x128xf32>
    %356 = vector.extract_strided_slice %355 {offsets = [0, 0], sizes = [8, 32], strides = [1, 1]} : vector<8x128xf32> to vector<8x32xf32>
    %357 = arith.negf %356 : vector<8x32xf32>
    %358 = math.exp %357 : vector<8x32xf32>
    %cst_70 = arith.constant 1.000000e+00 : f32
    %359 = vector.broadcast %cst_70 : f32 to vector<8x32xf32>
    %360 = arith.addf %359, %358 : vector<8x32xf32>
    %361 = arith.divf %359, %360 : vector<8x32xf32>
    %362 = vector.extract_strided_slice %355 {offsets = [0, 32], sizes = [8, 32], strides = [1, 1]} : vector<8x128xf32> to vector<8x32xf32>
    %363 = arith.negf %362 : vector<8x32xf32>
    %364 = math.exp %363 : vector<8x32xf32>
    %cst_71 = arith.constant 1.000000e+00 : f32
    %365 = vector.broadcast %cst_71 : f32 to vector<8x32xf32>
    %366 = arith.addf %365, %364 : vector<8x32xf32>
    %367 = arith.divf %365, %366 : vector<8x32xf32>
    %368 = vector.extract_strided_slice %355 {offsets = [0, 64], sizes = [8, 32], strides = [1, 1]} : vector<8x128xf32> to vector<8x32xf32>
    %369 = math.tanh %368 : vector<8x32xf32>
    %370 = vector.extract_strided_slice %355 {offsets = [0, 96], sizes = [8, 32], strides = [1, 1]} : vector<8x128xf32> to vector<8x32xf32>
    %371 = arith.negf %370 : vector<8x32xf32>
    %372 = math.exp %371 : vector<8x32xf32>
    %cst_72 = arith.constant 1.000000e+00 : f32
    %373 = vector.broadcast %cst_72 : f32 to vector<8x32xf32>
    %374 = arith.addf %373, %372 : vector<8x32xf32>
    %375 = arith.divf %373, %374 : vector<8x32xf32>
    %376 = arith.mulf %367, %350 : vector<8x32xf32>
    %377 = arith.mulf %361, %369 : vector<8x32xf32>
    %378 = arith.addf %376, %377 : vector<8x32xf32>
    %379 = math.tanh %378 : vector<8x32xf32>
    %380 = arith.mulf %375, %379 : vector<8x32xf32>
    %c2 = arith.constant 2 : index
    %c0_73 = arith.constant 0 : index
    %c0_74 = arith.constant 0 : index
    %381 = vector.load %arg7[%c2, %c0_73, %c0_74] : memref<3x32x32xf32, #tpu.memory_space<vmem>>, vector<1x32x32xf32>
    %382 = vector.shape_cast %381 : vector<1x32x32xf32> to vector<32x32xf32>
    %cst_75 = arith.constant dense<0.000000e+00> : vector<8x32xf32>
    %383 = tpu.matmul %380, %382, %cst_75 {dimension_numbers = #tpu.dot_dimension_numbers<[1], [0], [0], [1], [0, 0, 1, 1], [], []>} : vector<8x32xf32>, vector<32x32xf32>, vector<8x32xf32> -> vector<8x32xf32>
    %c2_76 = arith.constant 2 : index
    %c0_77 = arith.constant 0 : index
    %c0_78 = arith.constant 0 : index
    %384 = vector.load %arg8[%c2_76, %c0_77, %c0_78] : memref<3x1x32xf32, #tpu.memory_space<vmem>>, vector<1x1x32xf32>
    %385 = vector.shape_cast %384 : vector<1x1x32xf32> to vector<1x32xf32>
    %386 = vector.broadcast %385 : vector<1x32xf32> to vector<8x32xf32>
    %387 = arith.addf %383, %386 : vector<8x32xf32>
    %388 = tpu.concatenate %387, %316 in 0 : vector<8x32xf32>, vector<8x32xf32> -> vector<16x32xf32>
    %cst_79 = arith.constant dense<0.000000e+00> : vector<16x128xf32>
    %389 = tpu.matmul %388, %243, %cst_79 {dimension_numbers = #tpu.dot_dimension_numbers<[1], [0], [0], [1], [0, 0, 1, 1], [], []>} : vector<16x32xf32>, vector<32x128xf32>, vector<16x128xf32> -> vector<16x128xf32>
    %390 = vector.broadcast %245 : vector<1x128xf32> to vector<16x128xf32>
    %391 = arith.addf %389, %390 : vector<16x128xf32>
    %cst_80 = arith.constant 0.000000e+00 : f32
    %392 = vector.broadcast %cst_80 : f32 to vector<8x32xf32>
    %cst_81 = arith.constant 0.000000e+00 : f32
    %393 = vector.broadcast %cst_81 : f32 to vector<8x32xf32>
    %394 = vector.extract_strided_slice %391 {offsets = [0, 0], sizes = [8, 128], strides = [1, 1]} : vector<16x128xf32> to vector<8x128xf32>
    %cst_82 = arith.constant dense<0.000000e+00> : vector<8x128xf32>
    %395 = tpu.matmul %392, %244, %cst_82 {dimension_numbers = #tpu.dot_dimension_numbers<[1], [0], [0], [1], [0, 0, 1, 1], [], []>} : vector<8x32xf32>, vector<32x128xf32>, vector<8x128xf32> -> vector<8x128xf32>
    %396 = arith.addf %394, %395 : vector<8x128xf32>
    %397 = vector.extract_strided_slice %396 {offsets = [0, 0], sizes = [8, 32], strides = [1, 1]} : vector<8x128xf32> to vector<8x32xf32>
    %398 = arith.negf %397 : vector<8x32xf32>
    %399 = math.exp %398 : vector<8x32xf32>
    %cst_83 = arith.constant 1.000000e+00 : f32
    %400 = vector.broadcast %cst_83 : f32 to vector<8x32xf32>
    %401 = arith.addf %400, %399 : vector<8x32xf32>
    %402 = arith.divf %400, %401 : vector<8x32xf32>
    %403 = vector.extract_strided_slice %396 {offsets = [0, 32], sizes = [8, 32], strides = [1, 1]} : vector<8x128xf32> to vector<8x32xf32>
    %404 = arith.negf %403 : vector<8x32xf32>
    %405 = math.exp %404 : vector<8x32xf32>
    %cst_84 = arith.constant 1.000000e+00 : f32
    %406 = vector.broadcast %cst_84 : f32 to vector<8x32xf32>
    %407 = arith.addf %406, %405 : vector<8x32xf32>
    %408 = arith.divf %406, %407 : vector<8x32xf32>
    %409 = vector.extract_strided_slice %396 {offsets = [0, 64], sizes = [8, 32], strides = [1, 1]} : vector<8x128xf32> to vector<8x32xf32>
    %410 = math.tanh %409 : vector<8x32xf32>
    %411 = vector.extract_strided_slice %396 {offsets = [0, 96], sizes = [8, 32], strides = [1, 1]} : vector<8x128xf32> to vector<8x32xf32>
    %412 = arith.negf %411 : vector<8x32xf32>
    %413 = math.exp %412 : vector<8x32xf32>
    %cst_85 = arith.constant 1.000000e+00 : f32
    %414 = vector.broadcast %cst_85 : f32 to vector<8x32xf32>
    %415 = arith.addf %414, %413 : vector<8x32xf32>
    %416 = arith.divf %414, %415 : vector<8x32xf32>
    %417 = arith.mulf %408, %393 : vector<8x32xf32>
    %418 = arith.mulf %402, %410 : vector<8x32xf32>
    %419 = arith.addf %417, %418 : vector<8x32xf32>
    %420 = math.tanh %419 : vector<8x32xf32>
    %421 = arith.mulf %416, %420 : vector<8x32xf32>
    %422 = vector.extract_strided_slice %391 {offsets = [8, 0], sizes = [8, 128], strides = [1, 1]} : vector<16x128xf32> to vector<8x128xf32>
    %cst_86 = arith.constant dense<0.000000e+00> : vector<8x128xf32>
    %423 = tpu.matmul %421, %244, %cst_86 {dimension_numbers = #tpu.dot_dimension_numbers<[1], [0], [0], [1], [0, 0, 1, 1], [], []>} : vector<8x32xf32>, vector<32x128xf32>, vector<8x128xf32> -> vector<8x128xf32>
    %424 = arith.addf %422, %423 : vector<8x128xf32>
    %425 = vector.extract_strided_slice %424 {offsets = [0, 0], sizes = [8, 32], strides = [1, 1]} : vector<8x128xf32> to vector<8x32xf32>
    %426 = arith.negf %425 : vector<8x32xf32>
    %427 = math.exp %426 : vector<8x32xf32>
    %cst_87 = arith.constant 1.000000e+00 : f32
    %428 = vector.broadcast %cst_87 : f32 to vector<8x32xf32>
    %429 = arith.addf %428, %427 : vector<8x32xf32>
    %430 = arith.divf %428, %429 : vector<8x32xf32>
    %431 = vector.extract_strided_slice %424 {offsets = [0, 32], sizes = [8, 32], strides = [1, 1]} : vector<8x128xf32> to vector<8x32xf32>
    %432 = arith.negf %431 : vector<8x32xf32>
    %433 = math.exp %432 : vector<8x32xf32>
    %cst_88 = arith.constant 1.000000e+00 : f32
    %434 = vector.broadcast %cst_88 : f32 to vector<8x32xf32>
    %435 = arith.addf %434, %433 : vector<8x32xf32>
    %436 = arith.divf %434, %435 : vector<8x32xf32>
    %437 = vector.extract_strided_slice %424 {offsets = [0, 64], sizes = [8, 32], strides = [1, 1]} : vector<8x128xf32> to vector<8x32xf32>
    %438 = math.tanh %437 : vector<8x32xf32>
    %439 = vector.extract_strided_slice %424 {offsets = [0, 96], sizes = [8, 32], strides = [1, 1]} : vector<8x128xf32> to vector<8x32xf32>
    %440 = arith.negf %439 : vector<8x32xf32>
    %441 = math.exp %440 : vector<8x32xf32>
    %cst_89 = arith.constant 1.000000e+00 : f32
    %442 = vector.broadcast %cst_89 : f32 to vector<8x32xf32>
    %443 = arith.addf %442, %441 : vector<8x32xf32>
    %444 = arith.divf %442, %443 : vector<8x32xf32>
    %445 = arith.mulf %436, %419 : vector<8x32xf32>
    %446 = arith.mulf %430, %438 : vector<8x32xf32>
    %447 = arith.addf %445, %446 : vector<8x32xf32>
    %448 = math.tanh %447 : vector<8x32xf32>
    %449 = arith.mulf %444, %448 : vector<8x32xf32>
    %c0_90 = arith.constant 0 : index
    %c0_91 = arith.constant 0 : index
    %c0_92 = arith.constant 0 : index
    %450 = vector.load %arg7[%c0_90, %c0_91, %c0_92] : memref<3x32x32xf32, #tpu.memory_space<vmem>>, vector<1x32x32xf32>
    %451 = vector.shape_cast %450 : vector<1x32x32xf32> to vector<32x32xf32>
    %cst_93 = arith.constant dense<0.000000e+00> : vector<8x32xf32>
    %452 = tpu.matmul %449, %451, %cst_93 {dimension_numbers = #tpu.dot_dimension_numbers<[1], [0], [0], [1], [0, 0, 1, 1], [], []>} : vector<8x32xf32>, vector<32x32xf32>, vector<8x32xf32> -> vector<8x32xf32>
    %c0_94 = arith.constant 0 : index
    %c0_95 = arith.constant 0 : index
    %c0_96 = arith.constant 0 : index
    %453 = vector.load %arg8[%c0_94, %c0_95, %c0_96] : memref<3x1x32xf32, #tpu.memory_space<vmem>>, vector<1x1x32xf32>
    %454 = vector.shape_cast %453 : vector<1x1x32xf32> to vector<1x32xf32>
    %455 = vector.broadcast %454 : vector<1x32xf32> to vector<8x32xf32>
    %456 = arith.addf %452, %455 : vector<8x32xf32>
    %c0_97 = arith.constant 0 : index
    %c0_98 = arith.constant 0 : index
    %457 = vector.load %arg9[%c0_97, %c0_98] : memref<32x128xf32, #tpu.memory_space<vmem>>, vector<32x128xf32>
    %cst_99 = arith.constant dense<0.000000e+00> : vector<8x128xf32>
    %458 = tpu.matmul %456, %457, %cst_99 {dimension_numbers = #tpu.dot_dimension_numbers<[1], [0], [0], [1], [0, 0, 1, 1], [], []>} : vector<8x32xf32>, vector<32x128xf32>, vector<8x128xf32> -> vector<8x128xf32>
    %c0_100 = arith.constant 0 : index
    %c0_101 = arith.constant 0 : index
    %459 = vector.load %arg10[%c0_100, %c0_101] : memref<1x128xf32, #tpu.memory_space<vmem>>, vector<1x128xf32>
    %460 = vector.broadcast %459 : vector<1x128xf32> to vector<8x128xf32>
    %461 = arith.addf %458, %460 : vector<8x128xf32>
    %c0_102 = arith.constant 0 : index
    %c0_103 = arith.constant 0 : index
    %462 = vector.load %arg11[%c0_102, %c0_103] : memref<8x128xf32, #tpu.memory_space<vmem>>, vector<8x128xf32>
    tpu.vector_store %arg11[%c0_102, %c0_103], %461 {strides = array<i32>} : memref<8x128xf32, #tpu.memory_space<vmem>>, vector<8x128xf32>,
    return
  }
}

</mosaic_0001>

<bundles_post_ra>
// kernel: forward.1
= control target key start
LH: loop header
LB: loop body
LE: loop exit
PB: predicated region body
PF: predicated region fallthrough
CT: control target
= control target key end

     0   :  { %16 = vsyncpa [#allocation3], 0  ;;  %s2796_s0 = inlined_call_operand.vmem [shape: f32[32,32], index: 0, kind: input, shape index: {}]   ;;  %s2797_s1 = inlined_call_operand.vmem [shape: f32[32,128], index: 1, kind: input, shape index: {}]   ;;  %s2798_s2 = inlined_call_operand.vmem [shape: f32[32,128], index: 2, kind: input, shape index: {}]   ;;  %s2799_s3 = inlined_call_operand.vmem [shape: f32[1,128], index: 3, kind: input, shape index: {}]   ;;  %s2800_s4 = inlined_call_operand.vmem [shape: f32[32,128], index: 4, kind: input, shape index: {}]   ;;  %s2801_s5 = inlined_call_operand.vmem [shape: f32[32,128], index: 5, kind: input, shape index: {}]   ;;  %s2802_s6 = inlined_call_operand.vmem [shape: f32[1,128], index: 6, kind: input, shape index: {}]   ;;  %s2803_s7 = inlined_call_operand.vmem [shape: f32[3,32,32], index: 7, kind: input, shape index: {}]   ;;  %s2804_s8 = inlined_call_operand.hbm [shape: f32[3,1,32], index: 8, kind: input, shape index: {}]   ;;  %s2805_s9 = inlined_call_operand.vmem [shape: f32[32,128], index: 9, kind: input, shape index: {}]   ;;  %s2806_s10 = inlined_call_operand.hbm [shape: f32[1,128], index: 10, kind: input, shape index: {}]   ;;  %s2807_s11 = inlined_call_operand.vmem [shape: f32[8,128], index: 11, kind: output, shape index: {}]  }
   0x1   :  { %17 = vsyncpa [#allocation5], 0  ;;  %s2357_s17 = smov [#allocation2]   ;;  %s2309_s21 = scalar_lea.hbm %s2804_s8, 48 }
   0x2   :  { %s39_s18 = sshll.u32 %s2357_s17, 4  ;;  %p2310_p0 = scmp.ne.s32.totalorder %s2804_s8, %s2309_s21  ;;  %s40_s18 = int_to_ptr.vmem [resolvable:$true] %s39_s18 }
   0x3   :  { %p2313_p1 = scmp.lt.u32.totalorder %s2309_s21, %s2804_s8 }
   0x5   :  { %p2315_p2 = pnand %p2313_p1, %p2310_p0 }
   0x7   :  { %2318 = shalt.err (!%p2315_p2)
}
   0x8   :  { %s2319_s26 = scalar_lea.vmem %s40_s18, 48  ;;  %s2323_s27 = scalar_lea.vmem %s40_s18, 64 }
   0x9   :  { %p2320_p3 = scmp.ne.s32.totalorder %s40_s18, %s2319_s26  ;;  %p2324_p4 = scmp.lt.s32.totalorder %s40_s18, %s40_s18 }
   0xa   :  { %p2325_p5 = scmp.lt.s32.totalorder %s2323_s27, %s2319_s26 }
   0xc   :  { %p2326_p6 = por %p2325_p5, %p2324_p4 }
   0xe   :  { %p2327_p7 = pnand %p2326_p6, %p2320_p3 }
  0x10   :  { %2330 = shalt.err (!%p2327_p7)
}
  0x11   :  { %s2358_s28 = smov 16   ;;  %s2359_s29 = smov 1  }
  0x12   :  { %45 = dma.hbm_to_vmem [thread:$0]  %s2804_s8, 48, %s40_s18, [#allocation3], %s2358_s28, %s2358_s28, %s2359_s29  }
  0x13   :  { %s2360_s13 = smov [#allocation4]   ;;  %s2331_s17 = scalar_lea.hbm %s2806_s10, 16 }
  0x14   :  { %s54_s14 = sshll.u32 %s2360_s13, 4  ;;  %p2332_p8 = scmp.ne.s32.totalorder %s2806_s10, %s2331_s17  ;;  %s55_s14 = int_to_ptr.vmem [resolvable:$true] %s54_s14 }
  0x15   :  { %p2335_p9 = scmp.lt.u32.totalorder %s2331_s17, %s2806_s10 }
  0x17   :  { %p2337_p10 = pnand %p2335_p9, %p2332_p8 }
  0x19   :  { %2340 = shalt.err (!%p2337_p10)
}
  0x1a   :  { %s2341_s23 = scalar_lea.vmem %s55_s14, 16  ;;  %s2345_s8 = scalar_lea.vmem %s55_s14, 32 }
  0x1b   :  { %p2342_p11 = scmp.ne.s32.totalorder %s55_s14, %s2341_s23  ;;  %p2346_p12 = scmp.lt.s32.totalorder %s55_s14, %s55_s14 }
  0x1c   :  { %p2347_p13 = scmp.lt.s32.totalorder %s2345_s8, %s2341_s23 }
  0x1e   :  { %p2348_p0 = por %p2347_p13, %p2346_p12 }
  0x20   :  { %p2349_p1 = pnand %p2348_p0, %p2342_p11 }
  0x22   :  { %2352 = shalt.err (!%p2349_p1)
}
  0x23   :  { %57 = dma.hbm_to_vmem [thread:$0]  %s2806_s10, 16, %s55_s14, [#allocation5]  }
  0x24   :  { %2353 = dma.done.wait [#allocation3], 48  }
  0x25   :  { %2354 = vsyncadd [#allocation3], 4294967248 }
  0x26   :  { %2355 = dma.done.wait [#allocation5], 16  }
  0x27   :  { %2356 = vsyncadd [#allocation5], 4294967280  ;;  %v2361_v0 = vmov 0.0|0.0   ;;  %vm2362_vm0 = vmmov 0   ;;  %v2363_v1 = vmov 0.0   ;;  %v68_v2 = vld [vmem:[%s2797_s1] sm:$0xff] }
  0x28   :  { %2090 = vmatprep.subr.bf16.mxu1 %v2361_v0  ;;  %1925 = vmatprep.mubr.msk.f32.mxu1 %vm2362_vm0, %v2363_v1  ;;  %v69_v3 = vld [vmem:[%s2797_s1 + $0x8] sm:$0xff]  ;;  %v177_v4 = vld [vmem:[%s2798_s2] sm:$0xff]  ;;  %vm79_vm1 = vcmask 261120   ;;  %v70_v7 = vld [vmem:[%s2797_s1 + $0x10] sm:$0xff]  ;;  %s2365_s29 = smov 32   ;;  %s2366_s10 = smov 80  }
  0x29   :  { %v2082_v5 = vpack.c.bf16 %v69_v3, %v68_v2  ;;  %v178_v6 = vld [vmem:[%s2798_s2 + $0x8] sm:$0xff]  ;;  %v71_v8 = vld [vmem:[%s2797_s1 + $0x18] sm:$0xff]  ;;  %v64_v11 = vld [vmem:[%s2796_s0] sm:$0xff]  ;;  %vm312_vm2 = vcmask 130048  }
  0x2a   :  { %v2475_v9 = vpack.c.bf16 %v178_v6, %v177_v4  ;;  %v2086_v10 = vpack.c.bf16 %v71_v8, %v70_v7  ;;  %v179_v12 = vld [vmem:[%s2798_s2 + $0x10] sm:$0xff]  ;;  %v180_v13 = vld [vmem:[%s2798_s2 + $0x18] sm:$0xff]  ;;  %1911 = vmatprep.mubr.msk.f32.mxu0 %vm79_vm1, %v64_v11  ;;  %v65_v15 = vld [vmem:[%s2796_s0 + $0x8] sm:$0xff] }
  0x2b   :  { %2083 = vmatprep.subr.bf16.mxu0 %v2082_v5  ;;  %v2488_v14 = vpack.c.bf16 %v180_v13, %v179_v12  ;;  %v66_v16 = vld [vmem:[%s2796_s0 + $0x10] sm:$0xff]  ;;  %v67_v17 = vld [vmem:[%s2796_s0 + $0x18] sm:$0xff]  ;;  %v1769_v18 = vld [vmem:[%s2799_s3] ss:$0 sm:$0xff]  ;;  %s2364_s3 = smov 96  }
  0x2c   :  { %2085 = vmatpush3.bf16.msra.mxu0 %v2082_v5  ;;  %2092 = vmatpush3.bf16.msra.mxu1 %v2475_v9 }
  0x2d   :  { %2087 = vmatprep.subr.bf16.mxu0 %v2086_v10  ;;  %2093 = vmatprep.subr.bf16.mxu1 %v2361_v0 }
  0x30   :  { %2089 = vmatpush3.bf16.msra.mxu0 %v2086_v10  ;;  %2095 = vmatpush3.bf16.msra.mxu1 %v2488_v14 }
  0x31   :  { %2096 = vmatprep.subr.bf16.mxu0 %v2361_v0  ;;  %2102 = vmatprep.subr.bf16.mxu1 %v2361_v0 }
  0x33   :  { %1912 = vmatmul.mubr.msk.f32.vlgmr.msra.gmra.mrb[0].mxu0 %vm79_vm1, %v65_v15  ;;  %1926 = vmatmul.mubr.f32.vlgmr.msra.gmra.mrb[0].mxu1 %v2363_v1 }
  0x34   :  { %1914 = vmatprep.mubr.msk.f32.mxu0 %vm79_vm1, %v66_v16  ;;  %2098 = vmatpush3.bf16.msra.mxu0 %v2475_v9 }
  0x35   :  { %2099 = vmatprep.subr.bf16.mxu0 %v2361_v0  ;;  %2104 = vmatpush3.bf16.msra.mxu1 %v2475_v9 }
  0x36   :  { %2105 = vmatprep.subr.bf16.mxu1 %v2361_v0  ;;  %1947 = vmatprep.mubr.msk.f32.mxu1 %vm2362_vm0, %v2363_v1 }
  0x37   :  { %1915 = vmatmul.mubr.msk.f32.gmra.mrb[2].mxu0 %vm79_vm1, %v67_v17 }
  0x38   :  { %2101 = vmatpush3.bf16.msra.mxu0 %v2488_v14  ;;  %1936 = vmatprep.mubr.msk.f32.mxu0 %vm2362_vm0, %v2363_v1 }
  0x39   :  { %2107 = vmatpush3.bf16.msra.mxu1 %v2488_v14  ;;  %2108 = vmatprep.subr.bf16.mxu0 %v2361_v0 }
 0x106   :  { %v1913_v19 = vpop.f32.mrb[0].mxu0  ;;  %v250_v20 = vpop.f32.mrb[0].mxu1 }
 0x107   :  { %v2521_v21 = vadd.f32 %v1913_v19, %v1769_v18  ;;  %v158_v22 = vpop.f32.mrb[1].mxu0  ;;  %v1927_v23 = vpop.f32.mrb[1].mxu1 }
 0x108   :  { %v2523_v24 = vadd.f32 %v1769_v18, %v158_v22 }
 0x10a   :  { %v254_v25 = vadd.f32 %v250_v20, %v2523_v24  ;;  %v1916_v26 = vpop.f32.mrb[2].mxu0 }
 0x10b   :  { %v2526_v27 = vadd.f32 %v1916_v26, %v1769_v18  ;;  %v168_v28 = vpop.f32.mrb[3].mxu0 }
 0x10c   :  { %2197 = vtanh.f32 %v254_v25  ;;  %v2528_v29 = vadd.f32 %v1769_v18, %v168_v28  ;;  %v1774_v33 = vmul.f32 -1.442695, %v254_v25 }
 0x10d   :  { %v255_v30 = vadd.f32 %v250_v20, %v2526_v27 }
 0x10f   :  { %2199 = vtanh.f32 %v255_v30  ;;  %v1775_v34 = vmul.f32 -1.442695, %v255_v30 }
 0x110   :  { %2201 = vpow2.f32 %v1774_v33 }
 0x111   :  { %2203 = vpow2.f32 %v1775_v34 }
 0x116   :  { %v2198_v31 = vpop.eup %2197 }
 0x117   :  { %265 = vrot.lane.b32.xlu0 %v2198_v31, %s2364_s3 }
 0x119   :  { %v2200_v32 = vpop.eup %2199 }
 0x11a   :  { %v2202_v35 = vpop.eup %2201 }
 0x11b   :  { %289 = vrot.lane.b32.xlu0 %v2200_v32, %s2364_s3  ;;  %v259_v36 = vadd.f32 1.0, %v2202_v35  ;;  %v2204_v37 = vpop.eup %2203 }
 0x11c   :  { %v283_v38 = vadd.f32 1.0, %v2204_v37 }
 0x11d   :  { %2205 = vrcp.f32 %v259_v36 }
 0x11e   :  { %2207 = vrcp.f32 %v283_v38 }
 0x127   :  { %v2206_v39 = vpop.eup %2205 }
 0x128   :  { %v2208_v42 = vpop.eup %2207  ;;  %v263_v45 = vmul.f32 0.0, %v2206_v39 }
 0x129   :  { %v287_v48 = vmul.f32 0.0, %v2208_v42 }
 0x189   :  { %v266_v40 = vpop.permute.xlu0 %265 }
 0x18a   :  { %v268_v41 = vmul.f32 %v2206_v39, %v266_v40 }
 0x18c   :  { %270 = vrot.lane.b32.xlu1 %v268_v41, %s2358_s28 }
 0x18d   :  { %v290_v43 = vpop.permute.xlu0 %289 }
 0x18e   :  { %v292_v44 = vmul.f32 %v2208_v42, %v290_v43 }
 0x190   :  { %294 = vrot.lane.b32.xlu1 %v292_v44, %s2358_s28 }
 0x1fe   :  { %v271_v46 = vpop.permute.xlu1 %270 }
 0x1ff   :  { %v273_v47 = vadd.f32 %v271_v46, %v263_v45 }
 0x201   :  { %2209 = vtanh.f32 %v273_v47 }
 0x202   :  { %v295_v49 = vpop.permute.xlu1 %294 }
 0x203   :  { %v297_v50 = vadd.f32 %v295_v49, %v287_v48 }
 0x205   :  { %2211 = vtanh.f32 %v297_v50 }
 0x20b   :  { %v2210_v51 = vpop.eup %2209 }
 0x20c   :  { %276 = vrot.lane.b32.xlu0 %v2210_v51, %s2365_s29 }
 0x20f   :  { %v2212_v52 = vpop.eup %2211 }
 0x210   :  { %300 = vrot.lane.b32.xlu1 %v2212_v52, %s2365_s29 }
 0x27e   :  { %v277_v53 = vpop.permute.xlu0 %276 }
 0x27f   :  { %v279_v54 = vmul.f32 %v2206_v39, %v277_v53 }
 0x281   :  { %305 = vrot.lane.b32.xlu0 %v279_v54, %s2366_s10 }
 0x282   :  { %v301_v55 = vpop.permute.xlu1 %300 }
 0x283   :  { %v303_v56 = vmul.f32 %v2208_v42, %v301_v55 }
 0x285   :  { %309 = vrot.lane.b32.xlu1 %v303_v56, %s2365_s29 }
 0x2f3   :  { %v2539_v57 = vpop.permute.xlu0 %305 }
 0x2f7   :  { %v2541_v58 = vpop.permute.xlu1 %309 }
 0x2f8   :  { %v313_v59 = vsel %vm312_vm2, %v2539_v57, %v2541_v58 }
 0x2f9   :  { %1937 = vmatmul.mubr.msk.f32.vlgmr.msra.gmra.mrb[4].mxu0 %vm79_vm1, %v313_v59 }
 0x2fa   :  { %2110 = vmatpush3.bf16.msra.mxu0 %v2475_v9  ;;  %1958 = vmatprep.mubr.msk.f32.mxu0 %vm2362_vm0, %v2363_v1 }
 0x2fb   :  { %2111 = vmatprep.subr.bf16.mxu0 %v2361_v0 }
 0x2fe   :  { %2113 = vmatpush3.bf16.msra.mxu0 %v2488_v14 }
 0x2ff   :  { %2122 = vmatprep.subr.bf16.mxu0 %v2361_v0 }
 0x3cc   :  { %v383_v60 = vpop.f32.mrb[4].mxu0 }
 0x3cd   :  { %v387_v61 = vadd.f32 %v383_v60, %v2521_v21  ;;  %v388_v62 = vadd.f32 %v383_v60, %v2528_v29  ;;  %v1938_v63 = vpop.f32.mrb[5].mxu0 }
 0x3cf   :  { %2213 = vtanh.f32 %v387_v61  ;;  %v1777_v4 = vmul.f32 -1.442695, %v387_v61  ;;  %v1778_v5 = vmul.f32 -1.442695, %v388_v62 }
 0x3d0   :  { %2215 = vtanh.f32 %v388_v62 }
 0x3d1   :  { %2217 = vpow2.f32 %v1777_v4 }
 0x3d2   :  { %2219 = vpow2.f32 %v1778_v5 }
 0x3d9   :  { %v2214_v2 = vpop.eup %2213 }
 0x3da   :  { %v2216_v3 = vpop.eup %2215  ;;  %398 = vrot.lane.b32.xlu0 %v2214_v2, %s2364_s3 }
 0x3db   :  { %422 = vrot.lane.b32.xlu1 %v2216_v3, %s2364_s3  ;;  %v2218_v6 = vpop.eup %2217 }
 0x3dc   :  { %v2220_v7 = vpop.eup %2219  ;;  %v392_v8 = vadd.f32 1.0, %v2218_v6 }
 0x3dd   :  { %v416_v9 = vadd.f32 1.0, %v2220_v7 }
 0x3de   :  { %2221 = vrcp.f32 %v392_v8 }
 0x3df   :  { %2223 = vrcp.f32 %v416_v9 }
 0x3e8   :  { %v2222_v10 = vpop.eup %2221 }
 0x3e9   :  { %v2224_v12 = vpop.eup %2223  ;;  %v396_v16 = vmul.f32 %v2222_v10, %v273_v47 }
 0x3ea   :  { %v420_v17 = vmul.f32 %v2224_v12, %v297_v50 }
 0x44c   :  { %v399_v11 = vpop.permute.xlu0 %398 }
 0x44d   :  { %v423_v13 = vpop.permute.xlu1 %422  ;;  %v401_v14 = vmul.f32 %v2222_v10, %v399_v11 }
 0x44e   :  { %v425_v15 = vmul.f32 %v2224_v12, %v423_v13 }
 0x44f   :  { %403 = vrot.lane.b32.xlu0 %v401_v14, %s2358_s28 }
 0x450   :  { %427 = vrot.lane.b32.xlu1 %v425_v15, %s2358_s28 }
 0x4c1   :  { %v404_v18 = vpop.permute.xlu0 %403 }
 0x4c2   :  { %v428_v19 = vpop.permute.xlu1 %427  ;;  %v406_v20 = vadd.f32 %v404_v18, %v396_v16 }
 0x4c3   :  { %v430_v22 = vadd.f32 %v428_v19, %v420_v17 }
 0x4c4   :  { %2225 = vtanh.f32 %v406_v20 }
 0x4c5   :  { %2227 = vtanh.f32 %v430_v22 }
 0x4ce   :  { %v2226_v23 = vpop.eup %2225 }
 0x4cf   :  { %v2228_v25 = vpop.eup %2227  ;;  %409 = vrot.lane.b32.xlu0 %v2226_v23, %s2365_s29 }
 0x4d0   :  { %433 = vrot.lane.b32.xlu1 %v2228_v25, %s2365_s29  ;;  %v706_v25 = vld [vmem:[%s2801_s5 + $0x8] sm:$0xff] }
 0x541   :  { %v410_v26 = vpop.permute.xlu0 %409 }
 0x542   :  { %v434_v28 = vpop.permute.xlu1 %433  ;;  %v412_v30 = vmul.f32 %v2222_v10, %v410_v26  ;;  %v703_v26 = vld [vmem:[%s2800_s4 + $0x10] sm:$0xff] }
 0x543   :  { %v436_v31 = vmul.f32 %v2224_v12, %v434_v28  ;;  %v704_v28 = vld [vmem:[%s2800_s4 + $0x18] sm:$0xff] }
 0x544   :  { %438 = vrot.lane.b32.xlu0 %v412_v30, %s2366_s10 }
 0x545   :  { %442 = vrot.lane.b32.xlu1 %v436_v31, %s2365_s29  ;;  %v2615_v31 = vpack.c.bf16 %v704_v28, %v703_v26 }
 0x5b6   :  { %v439_v32 = vpop.permute.xlu0 %438 }
 0x5b7   :  { %v2563_v33 = vpop.permute.xlu1 %442 }
 0x5b8   :  { %v445_v34 = vsel %vm312_vm2, %v439_v32, %v2563_v33 }
 0x5b9   :  { %1948 = vmatmul.mubr.msk.f32.vlgmr.msra.gmra.mrb[2].mxu1 %vm79_vm1, %v445_v34  ;;  %v707_v34 = vld [vmem:[%s2801_s5 + $0x10] sm:$0xff] }
 0x68c   :  { %v515_v35 = vpop.f32.mrb[2].mxu1 }
 0x68d   :  { %v519_v36 = vadd.f32 %v515_v35, %v2528_v29  ;;  %v520_v37 = vadd.f32 %v515_v35, %v2521_v21  ;;  %v1949_v38 = vpop.f32.mrb[3].mxu1  ;;  %v708_v35 = vld [vmem:[%s2801_s5 + $0x18] sm:$0xff] }
 0x68f   :  { %2229 = vtanh.f32 %v519_v36  ;;  %v1780_v41 = vmul.f32 -1.442695, %v519_v36  ;;  %v1781_v42 = vmul.f32 -1.442695, %v520_v37  ;;  %v2631_v36 = vpack.c.bf16 %v708_v35, %v707_v34 }
 0x690   :  { %2231 = vtanh.f32 %v520_v37 }
 0x691   :  { %2233 = vpow2.f32 %v1780_v41 }
 0x692   :  { %2235 = vpow2.f32 %v1781_v42 }
 0x699   :  { %v2230_v39 = vpop.eup %2229 }
 0x69a   :  { %v2232_v40 = vpop.eup %2231  ;;  %530 = vrot.lane.b32.xlu0 %v2230_v39, %s2364_s3 }
 0x69b   :  { %554 = vrot.lane.b32.xlu1 %v2232_v40, %s2364_s3  ;;  %v2234_v43 = vpop.eup %2233 }
 0x69c   :  { %v2236_v44 = vpop.eup %2235  ;;  %v524_v45 = vadd.f32 1.0, %v2234_v43 }
 0x69d   :  { %v548_v46 = vadd.f32 1.0, %v2236_v44 }
 0x69e   :  { %2237 = vrcp.f32 %v524_v45 }
 0x69f   :  { %2239 = vrcp.f32 %v548_v46 }
 0x6a8   :  { %v2238_v21 = vpop.eup %2237 }
 0x6a9   :  { %v2240_v47 = vpop.eup %2239  ;;  %v528_v51 = vmul.f32 %v2238_v21, %v406_v20  ;;  %v702_v20 = vld [vmem:[%s2800_s4 + $0x8] sm:$0xff] }
 0x6aa   :  { %v552_v52 = vmul.f32 %v2240_v47, %v430_v22  ;;  %v705_v22 = vld [vmem:[%s2801_s5] sm:$0xff] }
 0x6ab   :  { %v2613_v30 = vpack.c.bf16 %v706_v25, %v705_v22 }
 0x70c   :  { %v531_v29 = vpop.permute.xlu0 %530 }
 0x70d   :  { %v555_v48 = vpop.permute.xlu1 %554  ;;  %v533_v49 = vmul.f32 %v2238_v21, %v531_v29 }
 0x70e   :  { %v557_v50 = vmul.f32 %v2240_v47, %v555_v48 }
 0x70f   :  { %535 = vrot.lane.b32.xlu0 %v533_v49, %s2358_s28 }
 0x710   :  { %559 = vrot.lane.b32.xlu1 %v557_v50, %s2358_s28 }
 0x781   :  { %v536_v53 = vpop.permute.xlu0 %535 }
 0x782   :  { %v560_v54 = vpop.permute.xlu1 %559  ;;  %v2574_v55 = vadd.f32 %v536_v53, %v528_v51  ;;  %v2658_v51 = vld [vmem:[%s2802_s6] ss:$0 sm:$0xff] }
 0x783   :  { %v562_v56 = vadd.f32 %v560_v54, %v552_v52 }
 0x784   :  { %2241 = vtanh.f32 %v2574_v55 }
 0x785   :  { %2243 = vtanh.f32 %v562_v56 }
 0x78e   :  { %v2242_v59 = vpop.eup %2241 }
 0x78f   :  { %v2244_v60 = vpop.eup %2243  ;;  %541 = vrot.lane.b32.xlu0 %v2242_v59, %s2365_s29 }
 0x790   :  { %565 = vrot.lane.b32.xlu1 %v2244_v60, %s2365_s29 }
 0x801   :  { %v542_v61 = vpop.permute.xlu0 %541 }
 0x802   :  { %v566_v62 = vpop.permute.xlu1 %565  ;;  %v544_v63 = vmul.f32 %v2238_v21, %v542_v61 }
 0x803   :  { %v568_v2 = vmul.f32 %v2240_v47, %v566_v62 }
 0x804   :  { %570 = vrot.lane.b32.xlu0 %v544_v63, %s2366_s10 }
 0x805   :  { %574 = vrot.lane.b32.xlu1 %v568_v2, %s2365_s29 }
 0x876   :  { %v2581_v3 = vpop.permute.xlu0 %570 }
 0x877   :  { %v575_v4 = vpop.permute.xlu1 %574 }
 0x878   :  { %v715_v5 = vsel %vm312_vm2, %v439_v32, %v575_v4  ;;  %v577_v6 = vsel %vm312_vm2, %v2581_v3, %v575_v4 }
 0x879   :  { %1959 = vmatmul.mubr.msk.f32.vlgmr.msra.gmra.mrb[6].mxu0 %vm79_vm1, %v577_v6  ;;  %1969 = vmatprep.mubr.msk.f32.mxu1 %vm79_vm1, %v715_v5 }
 0x87a   :  { %1980 = vmatprep.mubr.msk.f32.mxu0 %vm2362_vm0, %v2363_v1  ;;  %2124 = vmatpush3.bf16.msra.mxu0 %v2613_v30 }
 0x87b   :  { %2125 = vmatprep.subr.bf16.mxu0 %v2361_v0 }
 0x87e   :  { %2127 = vmatpush3.bf16.msra.mxu0 %v2631_v36 }
 0x87f   :  { %2134 = vmatprep.subr.bf16.mxu0 %v2361_v0 }
 0x881   :  { %1981 = vmatmul.mubr.f32.vlgmr.msra.gmra.mrb[8].mxu0 %v2363_v1 }
 0x882   :  { %2002 = vmatprep.mubr.msk.f32.mxu0 %vm2362_vm0, %v2363_v1 }
 0x94c   :  { %v647_v7 = vpop.f32.mrb[6].mxu0 }
 0x94d   :  { %v652_v8 = vadd.f32 %v647_v7, %v2523_v24  ;;  %v1960_v9 = vpop.f32.mrb[7].mxu0  ;;  %v701_v24 = vld [vmem:[%s2800_s4] sm:$0xff]  ;;  %v651_v37 = vadd.f32 %v647_v7, %v2526_v27 }
 0x94e   :  { %v2602_v23 = vpack.c.bf16 %v702_v20, %v701_v24 }
 0x94f   :  { %2245 = vtanh.f32 %v652_v8  ;;  %v1784_v11 = vmul.f32 -1.442695, %v652_v8  ;;  %v1783_v41 = vmul.f32 -1.442695, %v651_v37 }
 0x950   :  { %2115 = vmatprep.subr.bf16.mxu1 %v2602_v23 }
 0x951   :  { %2247 = vpow2.f32 %v1784_v11  ;;  %2117 = vmatpush3.bf16.msra.mxu1 %v2602_v23 }
 0x952   :  { %2119 = vmatprep.subr.bf16.mxu1 %v2615_v31 }
 0x954   :  { %v2651_v29 = vpop.f32.mrb[8].mxu0 }
 0x955   :  { %2121 = vmatpush3.bf16.msra.mxu1 %v2615_v31 }
 0x956   :  { %2128 = vmatprep.subr.bf16.mxu1 %v2361_v0 }
 0x959   :  { %v2246_v10 = vpop.eup %2245 }
 0x95a   :  { %686 = vrot.lane.b32.xlu0 %v2246_v10, %s2364_s3 }
 0x95b   :  { %v2248_v12 = vpop.eup %2247 }
 0x95c   :  { %v680_v13 = vadd.f32 1.0, %v2248_v12 }
 0x95e   :  { %2249 = vrcp.f32 %v680_v13 }
 0x968   :  { %v2250_v14 = vpop.eup %2249 }
 0x969   :  { %v684_v17 = vmul.f32 %v2250_v14, %v562_v56 }
 0x9cc   :  { %v687_v15 = vpop.permute.xlu0 %686 }
 0x9cd   :  { %v689_v16 = vmul.f32 %v2250_v14, %v687_v15  ;;  %v1086_v15 = vsel %vm312_vm2, %v2581_v3, %v2563_v33 }
 0x9cf   :  { %691 = vrot.lane.b32.xlu1 %v689_v16, %s2358_s28 }
 0xa41   :  { %v692_v18 = vpop.permute.xlu1 %691 }
 0xa42   :  { %v694_v19 = vadd.f32 %v692_v18, %v684_v17 }
 0xa44   :  { %2251 = vtanh.f32 %v694_v19 }
 0xa45   :  { %2253 = vtanh.f32 %v651_v37 }
 0xa46   :  { %2255 = vpow2.f32 %v1783_v41 }
 0xa4e   :  { %v2252_v32 = vpop.eup %2251 }
 0xa4f   :  { %697 = vrot.lane.b32.xlu0 %v2252_v32, %s2365_s29  ;;  %v2254_v40 = vpop.eup %2253 }
 0xa50   :  { %v2256_v42 = vpop.eup %2255 }
 0xa51   :  { %v656_v43 = vadd.f32 1.0, %v2256_v42 }
 0xa53   :  { %2257 = vrcp.f32 %v656_v43 }
 0xa5d   :  { %v2258_v45 = vpop.eup %2257 }
 0xa5e   :  { %v660_v47 = vmul.f32 %v2258_v45, %v2574_v55 }
 0xac1   :  { %v698_v38 = vpop.permute.xlu0 %697 }
 0xac2   :  { %v700_v39 = vmul.f32 %v2250_v14, %v698_v38 }
 0xac4   :  { %711 = vrot.lane.b32.xlu1 %v700_v39, %s2365_s29 }
 0xac8   :  { %662 = vrot.lane.b32.xlu1 %v2254_v40, %s2364_s3 }
 0xb36   :  { %v712_v44 = vpop.permute.xlu1 %711 }
 0xb37   :  { %v714_v27 = vsel %vm312_vm2, %v2539_v57, %v712_v44  ;;  %v1982_v57 = vpop.f32.mrb[9].mxu0 }
 0xb38   :  { %1970 = vmatmul.mubr.msk.f32.vlgmr.msra.gmra.mrb[4].mxu1 %vm79_vm1, %v714_v27 }
 0xb39   :  { %2130 = vmatpush3.bf16.msra.mxu1 %v2613_v30  ;;  %1991 = vmatprep.mubr.msk.f32.mxu1 %vm2362_vm0, %v2363_v1 }
 0xb3a   :  { %v663_v46 = vpop.permute.xlu1 %662  ;;  %2131 = vmatprep.subr.bf16.mxu1 %v2361_v0 }
 0xb3b   :  { %v665_v21 = vmul.f32 %v2258_v45, %v663_v46 }
 0xb3d   :  { %667 = vrot.lane.b32.xlu1 %v665_v21, %s2358_s28  ;;  %2133 = vmatpush3.bf16.msra.mxu1 %v2631_v36  ;;  %s2367_s28 = smov 64  }
 0xb3e   :  { %2141 = vmatprep.subr.bf16.mxu1 %v2602_v23 }
 0xbaf   :  { %v668_v48 = vpop.permute.xlu1 %667 }
 0xbb0   :  { %v670_v49 = vadd.f32 %v668_v48, %v660_v47  ;;  %v1791_v47 = vld [vmem:[%s2803_s7 + $0x20] sm:$0xff]  ;;  %v1792_v48 = vld [vmem:[%s2803_s7 + $0x28] sm:$0xff] }
 0xbb2   :  { %2259 = vtanh.f32 %v670_v49  ;;  %v1793_v49 = vld [vmem:[%s2803_s7 + $0x30] sm:$0xff] }
 0xbbc   :  { %v2260_v50 = vpop.eup %2259 }
 0xbbd   :  { %673 = vrot.lane.b32.xlu1 %v2260_v50, %s2365_s29  ;;  %v2135_v50 = vpack.c.bf16 %v1792_v48, %v1791_v47 }
 0xbbf   :  { %2136 = vmatpush3.bf16.msra.mxu0 %v2135_v50 }
 0xbc0   :  { %2137 = vmatprep.subr.bf16.mxu0 %v2361_v0 }
 0xc0b   :  { %v1971_v52 = vpop.f32.mrb[4].mxu1 }
 0xc0c   :  { %v794_v53 = vpop.f32.mrb[5].mxu1 }
 0xc0d   :  { %v795_v54 = vadd.f32 %v2658_v51, %v794_v53 }
 0xc0f   :  { %v873_v56 = vadd.f32 %v2651_v29, %v795_v54 }
 0xc11   :  { %2261 = vtanh.f32 %v873_v56  ;;  %v1788_v61 = vmul.f32 -1.442695, %v873_v56 }
 0xc13   :  { %2263 = vpow2.f32 %v1788_v61 }
 0xc1b   :  { %v2262_v59 = vpop.eup %2261 }
 0xc1c   :  { %883 = vrot.lane.b32.xlu0 %v2262_v59, %s2367_s28 }
 0xc1d   :  { %v2264_v62 = vpop.eup %2263 }
 0xc1e   :  { %v877_v63 = vadd.f32 1.0, %v2264_v62 }
 0xc20   :  { %2265 = vrcp.f32 %v877_v63 }
 0xc2a   :  { %v2266_v2 = vpop.eup %2265 }
 0xc2b   :  { %v881_v6 = vmul.f32 0.0, %v2266_v2 }
 0xc2f   :  { %v674_v55 = vpop.permute.xlu1 %673 }
 0xc30   :  { %v676_v60 = vmul.f32 %v2258_v45, %v674_v55 }
 0xc32   :  { %1088 = vrot.lane.b32.xlu1 %v676_v60, %s2366_s10 }
 0xc8e   :  { %v884_v4 = vpop.permute.xlu0 %883 }
 0xc8f   :  { %v886_v5 = vmul.f32 %v2266_v2, %v884_v4 }
 0xc91   :  { %888 = vrot.lane.b32.xlu0 %v886_v5, %s2365_s29 }
 0xca4   :  { %v1089_v12 = vpop.permute.xlu1 %1088 }
 0xca5   :  { %v1091_v14 = vsel %vm312_vm2, %v1089_v12, %v2541_v58  ;;  %v800_v58 = vadd.f32 %v1971_v52, %v2658_v51  ;;  %v1794_v52 = vld [vmem:[%s2803_s7 + $0x38] sm:$0xff] }
 0xca6   :  { %v2138_v53 = vpack.c.bf16 %v1794_v52, %v1793_v49 }
 0xca8   :  { %2139 = vmatpush3.bf16.msra.mxu0 %v2138_v53 }
 0xca9   :  { %2148 = vmatprep.subr.bf16.mxu0 %v2361_v0 }
 0xd03   :  { %v889_v7 = vpop.permute.xlu0 %888 }
 0xd04   :  { %v891_v8 = vadd.f32 %v889_v7, %v881_v6 }
 0xd06   :  { %2267 = vtanh.f32 %v891_v8 }
 0xd10   :  { %v2268_v9 = vpop.eup %2267 }
 0xd11   :  { %894 = vrot.lane.b32.xlu0 %v2268_v9, %s2367_s28 }
 0xd83   :  { %v895_v10 = vpop.permute.xlu0 %894 }
 0xd84   :  { %v897_v11 = vmul.f32 %v2266_v2, %v895_v10 }
 0xd86   :  { %899 = vrot.lane.b32.xlu0 %v897_v11, %s2365_s29 }
 0xdf8   :  { %v900_v13 = vpop.permute.xlu0 %899 }
 0xdf9   :  { %1992 = vmatmul.mubr.msk.f32.vlgmr.msra.gmra.mrb[6].mxu1 %vm79_vm1, %v900_v13 }
 0xdfa   :  { %2143 = vmatpush3.bf16.msra.mxu1 %v2602_v23  ;;  %2013 = vmatprep.mubr.msk.f32.mxu1 %vm79_vm1, %v1091_v14 }
 0xdfb   :  { %2145 = vmatprep.subr.bf16.mxu1 %v2615_v31 }
 0xdfe   :  { %2147 = vmatpush3.bf16.msra.mxu1 %v2615_v31 }
 0xdff   :  { %2154 = vmatprep.subr.bf16.mxu1 %v2361_v0 }
 0xe01   :  { %2014 = vmatmul.mubr.msk.f32.vlgmr.msra.gmra.mrb[8].mxu1 %vm79_vm1, %v1086_v15 }
 0xe02   :  { %2035 = vmatprep.mubr.msk.f32.mxu1 %vm2362_vm0, %v2363_v1 }
 0xecc   :  { %v969_v16 = vpop.f32.mrb[6].mxu1 }
 0xecd   :  { %v973_v17 = vadd.f32 %v969_v16, %v800_v58  ;;  %v1993_v18 = vpop.f32.mrb[7].mxu1  ;;  %v1802_v58 = vld [vmem:[%s2803_s7 + $0x40] sm:$0xff]  ;;  %v1803_v16 = vld [vmem:[%s2803_s7 + $0x48] sm:$0xff] }
 0xece   :  { %v2155_v18 = vpack.c.bf16 %v1803_v16, %v1802_v58  ;;  %v1813_v16 = vld [vmem:[#allocation2] ss:$0 sm:$0xff] }
 0xecf   :  { %2269 = vtanh.f32 %v973_v17  ;;  %v1790_v3 = vmul.f32 -1.442695, %v973_v17  ;;  %v1804_v17 = vld [vmem:[%s2803_s7 + $0x50] sm:$0xff] }
 0xed0   :  { %2156 = vmatpush3.bf16.msra.mxu1 %v2155_v18 }
 0xed1   :  { %2157 = vmatprep.subr.bf16.mxu1 %v2361_v0 }
 0xed4   :  { %v2682_v19 = vpop.f32.mrb[8].mxu1 }
 0xed5   :  { %v1164_v24 = vpop.f32.mrb[9].mxu1  ;;  %v1170_v4 = vadd.f32 %v2682_v19, %v2658_v51  ;;  %v1805_v19 = vld [vmem:[%s2803_s7 + $0x58] sm:$0xff] }
 0xed6   :  { %v1165_v20 = vadd.f32 %v2658_v51, %v1164_v24  ;;  %v2158_v24 = vpack.c.bf16 %v1805_v19, %v1804_v17  ;;  %v1815_v19 = vld [vmem:[#allocation4] ss:$0 sm:$0xff] }
 0xed8   :  { %v1173_v22 = vadd.f32 %v1165_v20, %v2651_v29  ;;  %2159 = vmatpush3.bf16.msra.mxu1 %v2158_v24 }
 0xed9   :  { %v2270_v25 = vpop.eup %2269  ;;  %2168 = vmatprep.subr.bf16.mxu1 %v2361_v0 }
 0xeda   :  { %2271 = vtanh.f32 %v1173_v22  ;;  %983 = vrot.lane.b32.xlu0 %v2270_v25, %s2367_s28  ;;  %v1799_v26 = vmul.f32 -1.442695, %v1173_v22 }
 0xedb   :  { %2273 = vpow2.f32 %v1790_v3  ;;  %v1806_v3 = vld [vmem:[#allocation2 + $0x2] ss:$0 sm:$0xff] }
 0xedc   :  { %2275 = vpow2.f32 %v1799_v26  ;;  %v1795_v26 = vld [vmem:[#allocation2 + $0x1] ss:$0 sm:$0xff] }
 0xee4   :  { %v2272_v33 = vpop.eup %2271 }
 0xee5   :  { %1183 = vrot.lane.b32.xlu1 %v2272_v33, %s2367_s28  ;;  %v2274_v28 = vpop.eup %2273 }
 0xee6   :  { %v977_v32 = vadd.f32 1.0, %v2274_v28  ;;  %v2276_v34 = vpop.eup %2275 }
 0xee7   :  { %v1177_v35 = vadd.f32 1.0, %v2276_v34 }
 0xee8   :  { %2277 = vrcp.f32 %v977_v32 }
 0xee9   :  { %2279 = vrcp.f32 %v1177_v35 }
 0xef2   :  { %v2278_v37 = vpop.eup %2277 }
 0xef3   :  { %v2280_v40 = vpop.eup %2279  ;;  %v981_v43 = vmul.f32 %v2278_v37, %v891_v8 }
 0xef4   :  { %v1181_v45 = vmul.f32 0.0, %v2280_v40 }
 0xf4c   :  { %v984_v38 = vpop.permute.xlu0 %983 }
 0xf4d   :  { %v986_v39 = vmul.f32 %v2278_v37, %v984_v38 }
 0xf4f   :  { %988 = vrot.lane.b32.xlu0 %v986_v39, %s2365_s29 }
 0xf57   :  { %v1184_v41 = vpop.permute.xlu1 %1183 }
 0xf58   :  { %v1186_v42 = vmul.f32 %v2280_v40, %v1184_v41 }
 0xf5a   :  { %1188 = vrot.lane.b32.xlu1 %v1186_v42, %s2365_s29 }
 0xfc1   :  { %v989_v44 = vpop.permute.xlu0 %988 }
 0xfc2   :  { %v991_v27 = vadd.f32 %v989_v44, %v981_v43 }
 0xfc4   :  { %2281 = vtanh.f32 %v991_v27 }
 0xfcc   :  { %v1189_v46 = vpop.permute.xlu1 %1188 }
 0xfcd   :  { %v1191_v21 = vadd.f32 %v1189_v46, %v1181_v45 }
 0xfce   :  { %v2282_v57 = vpop.eup %2281 }
 0xfcf   :  { %2283 = vtanh.f32 %v1191_v21  ;;  %994 = vrot.lane.b32.xlu0 %v2282_v57, %s2367_s28 }
 0xfd9   :  { %v2284_v54 = vpop.eup %2283 }
 0xfda   :  { %1194 = vrot.lane.b32.xlu1 %v2284_v54, %s2367_s28 }
0x1041   :  { %v995_v56 = vpop.permute.xlu0 %994 }
0x1042   :  { %v997_v59 = vmul.f32 %v2278_v37, %v995_v56 }
0x1044   :  { %1012 = vrot.lane.b32.xlu0 %v997_v59, %s2365_s29 }
0x104c   :  { %v1195_v55 = vpop.permute.xlu1 %1194 }
0x104d   :  { %v1197_v60 = vmul.f32 %v2280_v40, %v1195_v55 }
0x104f   :  { %1199 = vrot.lane.b32.xlu1 %v1197_v60, %s2365_s29 }
0x10b6   :  { %v1013_v61 = vpop.permute.xlu0 %1012 }
0x10b7   :  { %2003 = vmatmul.mubr.msk.f32.vlgmr.msra.gmra.mrb[10].mxu0 %vm79_vm1, %v1013_v61 }
0x10b8   :  { %2150 = vmatpush3.bf16.msra.mxu0 %v2613_v30  ;;  %2024 = vmatprep.mubr.msk.f32.mxu0 %vm2362_vm0, %v2363_v1 }
0x10b9   :  { %2151 = vmatprep.subr.bf16.mxu0 %v2361_v0 }
0x10bc   :  { %2153 = vmatpush3.bf16.msra.mxu0 %v2631_v36 }
0x10bd   :  { %2161 = vmatprep.subr.bf16.mxu0 %v2602_v23 }
0x10c1   :  { %v1200_v62 = vpop.permute.xlu1 %1199 }
0x10c2   :  { %2025 = vmatmul.mubr.msk.f32.vlgmr.msra.gmra.mrb[12].mxu0 %vm79_vm1, %v1200_v62 }
0x10c3   :  { %2163 = vmatpush3.bf16.msra.mxu0 %v2602_v23 }
0x10c4   :  { %2165 = vmatprep.subr.bf16.mxu0 %v2615_v31 }
0x10c7   :  { %2167 = vmatpush3.bf16.msra.mxu0 %v2615_v31 }
0x10c8   :  { %2174 = vmatprep.subr.bf16.mxu0 %v2361_v0 }
0x118a   :  { %v1082_v63 = vpop.f32.mrb[10].mxu0 }
0x118b   :  { %v2004_v2 = vpop.f32.mrb[11].mxu0  ;;  %v1083_v35 = vadd.f32 %v1795_v26, %v1082_v63 }
0x118c   :  { %v1592_v2 = vld [vmem:[%s2803_s7] sm:$0xff] }
0x1195   :  { %v1269_v5 = vpop.f32.mrb[12].mxu0 }
0x1196   :  { %v1273_v6 = vadd.f32 %v1269_v5, %v1170_v4  ;;  %v2026_v7 = vpop.f32.mrb[13].mxu0  ;;  %v1593_v4 = vld [vmem:[%s2803_s7 + $0x8] sm:$0xff]  ;;  %v1594_v5 = vld [vmem:[%s2803_s7 + $0x10] sm:$0xff] }
0x1197   :  { %v1595_v7 = vld [vmem:[%s2803_s7 + $0x18] sm:$0xff] }
0x1198   :  { %2285 = vtanh.f32 %v1273_v6  ;;  %v1801_v9 = vmul.f32 -1.442695, %v1273_v6  ;;  %v2175_v6 = vpack.c.bf16 %v1593_v4, %v1592_v2 }
0x119a   :  { %2287 = vpow2.f32 %v1801_v9 }
0x11a2   :  { %v2286_v8 = vpop.eup %2285 }
0x11a3   :  { %1283 = vrot.lane.b32.xlu0 %v2286_v8, %s2367_s28  ;;  %v2178_v8 = vpack.c.bf16 %v1595_v7, %v1594_v5 }
0x11a4   :  { %v2288_v23 = vpop.eup %2287 }
0x11a5   :  { %v1277_v10 = vadd.f32 1.0, %v2288_v23  ;;  %v1678_v23 = vld [vmem:[%s2805_s9] sm:$0xff] }
0x11a7   :  { %2289 = vrcp.f32 %v1277_v10  ;;  %v1679_v10 = vld [vmem:[%s2805_s9 + $0x8] sm:$0xff] }
0x11b1   :  { %v2290_v31 = vpop.eup %2289 }
0x11b2   :  { %v1281_v13 = vmul.f32 %v2290_v31, %v1191_v21 }
0x1215   :  { %v1284_v11 = vpop.permute.xlu0 %1283 }
0x1216   :  { %v1286_v12 = vmul.f32 %v2290_v31, %v1284_v11 }
0x1218   :  { %1288 = vrot.lane.b32.xlu1 %v1286_v12, %s2365_s29 }
0x128a   :  { %v1289_v14 = vpop.permute.xlu1 %1288 }
0x128b   :  { %v1291_v15 = vadd.f32 %v1289_v14, %v1281_v13  ;;  %v1680_v14 = vld [vmem:[%s2805_s9 + $0x10] sm:$0xff] }
0x128d   :  { %2291 = vtanh.f32 %v1291_v15  ;;  %v1681_v15 = vld [vmem:[%s2805_s9 + $0x18] sm:$0xff] }
0x128e   :  { %v2184_v58 = vpack.c.bf16 %v1681_v15, %v1680_v14 }
0x1297   :  { %v2292_v20 = vpop.eup %2291 }
0x1298   :  { %1294 = vrot.lane.b32.xlu0 %v2292_v20, %s2367_s28 }
0x130a   :  { %v1295_v22 = vpop.permute.xlu0 %1294 }
0x130b   :  { %v1297_v25 = vmul.f32 %v2290_v31, %v1295_v22  ;;  %v2181_v31 = vpack.c.bf16 %v1679_v10, %v1678_v23 }
0x130d   :  { %1312 = vrot.lane.b32.xlu1 %v1297_v25, %s2365_s29 }
0x137f   :  { %v1313_v33 = vpop.permute.xlu1 %1312 }
0x1380   :  { %2036 = vmatmul.mubr.msk.f32.vlgmr.msra.gmra.mrb[10].mxu1 %vm79_vm1, %v1313_v33 }
0x1381   :  { %2170 = vmatpush3.bf16.msra.mxu1 %v2613_v30  ;;  %2057 = vmatprep.mubr.msk.f32.mxu1 %vm2362_vm0, %v2363_v1 }
0x1382   :  { %2171 = vmatprep.subr.bf16.mxu1 %v2361_v0 }
0x1385   :  { %2173 = vmatpush3.bf16.msra.mxu1 %v2631_v36 }
0x1386   :  { %2180 = vmatprep.subr.bf16.mxu1 %v2361_v0 }
0x1453   :  { %v1382_v28 = vpop.f32.mrb[10].mxu1 }
0x1454   :  { %v1383_v32 = vadd.f32 %v1806_v3, %v1382_v28  ;;  %v2037_v34 = vpop.f32.mrb[11].mxu1 }
0x1456   :  { %2046 = vmatprep.mubr.msk.f32.mxu0 %vm79_vm1, %v1383_v32 }
0x1457   :  { %2047 = vmatmul.mubr.msk.f32.vlgmr.msra.gmra.mrb[14].mxu0 %vm79_vm1, %v1083_v35 }
0x1458   :  { %2068 = vmatprep.mubr.msk.f32.mxu0 %vm2362_vm0, %v2363_v1  ;;  %2176 = vmatpush3.bf16.msra.mxu0 %v2175_v6 }
0x1459   :  { %2177 = vmatprep.subr.bf16.mxu0 %v2361_v0 }
0x145c   :  { %2179 = vmatpush3.bf16.msra.mxu0 %v2178_v8 }
0x152a   :  { %v2048_v30 = vpop.f32.mrb[14].mxu0 }
0x152b   :  { %v1458_v37 = vpop.f32.mrb[15].mxu0  ;;  %v1464_v49 = vadd.f32 %v2048_v30, %v2658_v51 }
0x152c   :  { %v1459_v38 = vadd.f32 %v2658_v51, %v1458_v37 }
0x152e   :  { %v1467_v36 = vadd.f32 %v1459_v38, %v2651_v29 }
0x1530   :  { %2293 = vtanh.f32 %v1467_v36  ;;  %v1810_v40 = vmul.f32 -1.442695, %v1467_v36 }
0x1532   :  { %2295 = vpow2.f32 %v1810_v40 }
0x153a   :  { %v2294_v39 = vpop.eup %2293 }
0x153b   :  { %1477 = vrot.lane.b32.xlu0 %v2294_v39, %s2367_s28 }
0x153c   :  { %v2296_v41 = vpop.eup %2295 }
0x153d   :  { %v1471_v42 = vadd.f32 1.0, %v2296_v41 }
0x153f   :  { %2297 = vrcp.f32 %v1471_v42 }
0x1549   :  { %v2298_v43 = vpop.eup %2297 }
0x154a   :  { %v1475_v45 = vmul.f32 0.0, %v2298_v43 }
0x15ad   :  { %v1478_v44 = vpop.permute.xlu0 %1477 }
0x15ae   :  { %v1480_v27 = vmul.f32 %v2298_v43, %v1478_v44 }
0x15b0   :  { %1482 = vrot.lane.b32.xlu1 %v1480_v27, %s2365_s29 }
0x1622   :  { %v1483_v46 = vpop.permute.xlu1 %1482 }
0x1623   :  { %v1485_v21 = vadd.f32 %v1483_v46, %v1475_v45 }
0x1625   :  { %2299 = vtanh.f32 %v1485_v21 }
0x162f   :  { %v2300_v57 = vpop.eup %2299 }
0x1630   :  { %1488 = vrot.lane.b32.xlu0 %v2300_v57, %s2367_s28 }
0x16a2   :  { %v1489_v29 = vpop.permute.xlu0 %1488 }
0x16a3   :  { %v1491_v47 = vmul.f32 %v2298_v43, %v1489_v29 }
0x16a5   :  { %1493 = vrot.lane.b32.xlu1 %v1491_v47, %s2365_s29 }
0x1717   :  { %v1494_v48 = vpop.permute.xlu1 %1493 }
0x1718   :  { %2058 = vmatmul.mubr.msk.f32.vlgmr.msra.gmra.mrb[12].mxu1 %vm79_vm1, %v1494_v48 }
0x1719   :  { %2079 = vmatprep.mubr.msk.f32.mxu1 %vm2362_vm0, %v2363_v1  ;;  %2182 = vmatpush3.bf16.msra.mxu1 %v2181_v31 }
0x171a   :  { %2183 = vmatprep.subr.bf16.mxu1 %v2361_v0 }
0x171d   :  { %2185 = vmatpush3.bf16.msra.mxu1 %v2184_v58 }
0x17eb   :  { %v1563_v50 = vpop.f32.mrb[12].mxu1 }
0x17ec   :  { %v1567_v52 = vadd.f32 %v1563_v50, %v1464_v49  ;;  %v2059_v53 = vpop.f32.mrb[13].mxu1 }
0x17ee   :  { %2301 = vtanh.f32 %v1567_v52  ;;  %v1812_v56 = vmul.f32 -1.442695, %v1567_v52 }
0x17f0   :  { %2303 = vpow2.f32 %v1812_v56 }
0x17f8   :  { %v2302_v54 = vpop.eup %2301 }
0x17f9   :  { %1577 = vrot.lane.b32.xlu0 %v2302_v54, %s2367_s28 }
0x17fa   :  { %v2304_v59 = vpop.eup %2303 }
0x17fb   :  { %v1571_v55 = vadd.f32 1.0, %v2304_v59 }
0x17fd   :  { %2305 = vrcp.f32 %v1571_v55 }
0x1807   :  { %v2306_v60 = vpop.eup %2305 }
0x1808   :  { %v1575_v1 = vmul.f32 %v2306_v60, %v1485_v21 }
0x186b   :  { %v1578_v61 = vpop.permute.xlu0 %1577 }
0x186c   :  { %v1580_v62 = vmul.f32 %v2306_v60, %v1578_v61 }
0x186e   :  { %1582 = vrot.lane.b32.xlu1 %v1580_v62, %s2365_s29 }
0x18e0   :  { %v1583_v63 = vpop.permute.xlu1 %1582 }
0x18e1   :  { %v1585_v51 = vadd.f32 %v1583_v63, %v1575_v1 }
0x18e3   :  { %2307 = vtanh.f32 %v1585_v51 }
0x18ed   :  { %v2308_v9 = vpop.eup %2307 }
0x18ee   :  { %1588 = vrot.lane.b32.xlu0 %v2308_v9, %s2367_s28 }
0x1960   :  { %v1589_v11 = vpop.permute.xlu0 %1588 }
0x1961   :  { %v1591_v12 = vmul.f32 %v2306_v60, %v1589_v11 }
0x1963   :  { %1604 = vrot.lane.b32.xlu1 %v1591_v12, %s2365_s29 }
0x19d5   :  { %v1605_v13 = vpop.permute.xlu1 %1604 }
0x19d6   :  { %2069 = vmatmul.mubr.msk.f32.vlgmr.msra.gmra.mrb[16].mxu0 %vm79_vm1, %v1605_v13 }
0x1aa9   :  { %v1674_v17 = vpop.f32.mrb[16].mxu0 }
0x1aaa   :  { %v1675_v0 = vadd.f32 %v1813_v16, %v1674_v17  ;;  %v2070_v18 = vpop.f32.mrb[17].mxu0 }
0x1aac   :  { %2080 = vmatmul.mubr.msk.f32.vlgmr.msra.gmra.mrb[14].mxu1 %vm79_vm1, %v1675_v0 }
0x1b7f   :  { %v1758_v24 = vpop.f32.mrb[14].mxu1 }
0x1b80   :  { %v1759_v20 = vadd.f32 %v1815_v19, %v1758_v24  ;;  %v2081_v22 = vpop.f32.mrb[15].mxu1 }
0x1b82   :  { %1762 = vst [vmem:[%s2807_s11] sm:$0xff] %v1759_v20 }
0x1b83   :  { %1767 = vsyncpa [#allocation3], 1 }
0x1b84   :  { %1768 = vsyncpa [#allocation5], 1 }

</bundles_post_ra>
